<compile_context>
chip_gen: v5e
topology: v5e:2x2
jax: 0.10.0
libtpu: 0.0.40
codegen_flags: <defaults>
</compile_context>

<pallas_src>
import math
import jax
import jax.numpy as jnp
from jax.experimental import pallas as pl
from jax.experimental.pallas import tpu as pltpu

# ---------------- model dims (small synthetic config) ----------------
D_MODEL = 32
N_HEADS = 4
D_HEAD = D_MODEL // N_HEADS
D_FF = 64
N_CLASSES = 5
LN_EPS = 1e-5
LOGIT_PAD = 128          # lane-dense width for slabs / classifier output

# bf16 weight-slab row offsets (all multiples of 16 = bf16 sublane tile)
W_WE = 0       # 16 rows  (c_in actual)
W_QKV = 16     # 32 rows  (D, 3D)
W_WO = 48      # 64 rows  (4 heads x 16-row slots, 8 rows used each)
W_W1 = 112     # 32 rows  (D, D_FF)
W_W2 = 144     # 64 rows  (D_FF, D)
W_WC = 208     # 32 rows  (D, 128)
W_POOL = 240   # 16 rows  (out_rows actual)
W_ROWS = 256

# f32 slab: rows 0:16 = packed biases/LN params, then tiled PE (N rows), then mask (N rows)
F_BIAS_ROWS = 16
(_R_BQKV, _R_BO, _R_G1, _R_B1LN, _R_B1, _R_B2, _R_G2, _R_B2LN, _R_BC) = range(9)


def _layernorm(x, gamma, beta):
    mean = jnp.mean(x, axis=-1, keepdims=True)
    var = jnp.mean((x - mean) ** 2, axis=-1, keepdims=True)
    return (x - mean) * jax.lax.rsqrt(var + LN_EPS) * gamma + beta


# ------------- fused kernel: embedding -> encoder layer -> cls head -------------
def fused_isfm_kernel(x_ref, w_ref, f_ref, o_ref):
    N, c_in = x_ref.shape              # N = B * L (flattened batch*seq rows)
    R = o_ref.shape[0]                 # sublane-padded output rows (>= B)
    D = D_MODEL
    bf16 = jnp.bfloat16
    f_pe = F_BIAS_ROWS
    f_neg = F_BIAS_ROWS + N

    # ---- static slab window loads (16-row-aligned sections; static offsets) ----
    we = w_ref[W_WE:W_WE + c_in, 0:D]                       # (c_in, D)  bf16
    wqkv = w_ref[W_QKV:W_QKV + D, 0:3 * D]                  # (D, 3D)    bf16
    w1 = w_ref[W_W1:W_W1 + D, 0:D_FF]                       # (D, D_FF)  bf16
    w2 = w_ref[W_W2:W_W2 + D_FF, 0:D]                       # (D_FF, D)  bf16
    wc = w_ref[W_WC:W_WC + D, :]                            # (D, 128)   bf16
    pool = w_ref[W_POOL:W_POOL + R, 0:N]                    # (R, N)     bf16

    biases = f_ref[0:F_BIAS_ROWS, :]                        # (16, 128)  f32
    bqkv = biases[_R_BQKV:_R_BQKV + 1, 0:3 * D]
    bo = biases[_R_BO:_R_BO + 1, 0:D]
    g1 = biases[_R_G1:_R_G1 + 1, 0:D]
    be1 = biases[_R_B1LN:_R_B1LN + 1, 0:D]
    b1 = biases[_R_B1:_R_B1 + 1, 0:D_FF]
    b2 = biases[_R_B2:_R_B2 + 1, 0:D]
    g2 = biases[_R_G2:_R_G2 + 1, 0:D]
    be2 = biases[_R_B2LN:_R_B2LN + 1, 0:D]
    bc = biases[_R_BC:_R_BC + 1, :]
    pe = f_ref[f_pe:f_pe + N, 0:D]                          # (N, D) f32, B-tiled, emb bias folded
    neg = f_ref[f_neg:f_neg + N, 0:N]                       # (N, N) f32 block-diagonal mask

    # ---- embedding: E_com_00_PE = linear projection + positional encoding ----
    h = jnp.dot(x_ref[...].astype(bf16), we,
                preferred_element_type=jnp.float32) + pe                     # (N, D) f32

    # ---- attention: single fused QKV projection ----
    qkv = jnp.dot(h.astype(bf16), wqkv,
                  preferred_element_type=jnp.float32) + bqkv                 # (N, 3D) f32
    qkv_b = qkv.astype(bf16)

    # per-head scores via dot_general (no transpose relayout), bf16 in / f32 acc
    scale = 1.0 / math.sqrt(D_HEAD)
    scores = []
    for hd in range(N_HEADS):
        qh = qkv_b[:, hd * D_HEAD:(hd + 1) * D_HEAD]
        kh = qkv_b[:, D + hd * D_HEAD:D + (hd + 1) * D_HEAD]
        s = jax.lax.dot_general(qh, kh, (((1,), (1,)), ((), ())),
                                preferred_element_type=jnp.float32)          # (N, N) f32
        scores.append(s * scale + neg)                                       # mask add in f32

    # stack heads on the sublane axis -> one wide softmax chain (f32 throughout)
    s_all = jnp.concatenate(scores, axis=0)                                  # (H*N, N)
    s_all = s_all - jnp.max(s_all, axis=-1, keepdims=True)
    p_all = jnp.exp(s_all)
    p_all = p_all * pl.reciprocal(jnp.sum(p_all, axis=-1, keepdims=True), approx=True)
    p_all = p_all.astype(bf16)

    # per-head PV dot + per-head output-projection accumulation (no lane concat)
    acc = None
    for hd in range(N_HEADS):
        p_h = p_all[hd * N:(hd + 1) * N, :]                                  # (N, N)  bf16
        vh = qkv_b[:, 2 * D + hd * D_HEAD:2 * D + (hd + 1) * D_HEAD]         # (N, Dh) bf16
        ho = jnp.dot(p_h, vh, preferred_element_type=jnp.float32)            # (N, Dh) f32
        wo_h = w_ref[W_WO + 16 * hd:W_WO + 16 * hd + D_HEAD, 0:D]            # (Dh, D) bf16
        contrib = jnp.dot(ho.astype(bf16), wo_h, preferred_element_type=jnp.float32)
        acc = contrib if acc is None else acc + contrib
    attn = acc + bo                                                          # (N, D) f32

    h1 = _layernorm(h + attn, g1, be1)

    # ---- FFN ----
    ffn = jnp.dot(h1.astype(bf16), w1, preferred_element_type=jnp.float32) + b1
    ffn = jnp.maximum(ffn, 0.0)                                              # ReLU
    ffn = jnp.dot(ffn.astype(bf16), w2, preferred_element_type=jnp.float32) + b2

    h2 = _layernorm(h1 + ffn, g2, be2)                                       # (N, D)

    # ---- task head: H_01_Linear_cla = mean pool over seq + linear classifier ----
    pooled = jnp.dot(pool, h2.astype(bf16), preferred_element_type=jnp.float32)   # (R, D)
    o_ref[...] = jnp.dot(pooled.astype(bf16), wc,
                         preferred_element_type=jnp.float32) + bc            # (R, 128) full-tile store


def fused_isfm_call(xf, wslab, fslab, out_rows):
    N, c_in = xf.shape

    def full(shape):
        return pl.BlockSpec(shape, lambda i, _n=len(shape): (0,) * _n)

    return pl.pallas_call(
        fused_isfm_kernel,
        out_shape=jax.ShapeDtypeStruct((out_rows, LOGIT_PAD), jnp.float32),
        grid=(1,),
        in_specs=[
            full((N, c_in)),        # x (flattened batch*seq), f32
            full(wslab.shape),      # bf16 weight slab
            full(fslab.shape),      # f32 bias/PE/mask slab
        ],
        out_specs=full((out_rows, LOGIT_PAD)),
        compiler_params=pltpu.CompilerParams(
            dimension_semantics=("arbitrary",)),
    )(xf, wslab, fslab)


# ---------------- glue: params, PE, packing, full forward ----------------
def sinusoidal_pe(L, D):
    pos = jnp.arange(L, dtype=jnp.float32)[:, None]
    i = jnp.arange(0, D, 2, dtype=jnp.float32)
    div = jnp.exp(-math.log(10000.0) * i / D)
    pe = jnp.zeros((L, D), jnp.float32)
    pe = pe.at[:, 0::2].set(jnp.sin(pos * div))
    pe = pe.at[:, 1::2].set(jnp.cos(pos * div))
    return pe


def init_params(key, c_in):
    keys = jax.random.split(key, 16)
    n = lambda k, s, scale: (scale * jax.random.normal(k, s)).astype(jnp.float32)
    return {
        # embedding
        "we": n(keys[0], (c_in, D_MODEL), 0.2),
        "be": jnp.zeros((1, D_MODEL), jnp.float32),
        # attention
        "wq": n(keys[1], (D_MODEL, D_MODEL), 0.1), "bq": jnp.zeros((1, D_MODEL), jnp.float32),
        "wk": n(keys[2], (D_MODEL, D_MODEL), 0.1), "bk": jnp.zeros((1, D_MODEL), jnp.float32),
        "wv": n(keys[3], (D_MODEL, D_MODEL), 0.1), "bv": jnp.zeros((1, D_MODEL), jnp.float32),
        "wo": n(keys[4], (D_MODEL, D_MODEL), 0.1), "bo": jnp.zeros((1, D_MODEL), jnp.float32),
        "ln1_g": jnp.ones((1, D_MODEL), jnp.float32), "ln1_b": jnp.zeros((1, D_MODEL), jnp.float32),
        # ffn
        "w1": n(keys[5], (D_MODEL, D_FF), 0.1), "b1": jnp.zeros((1, D_FF), jnp.float32),
        "w2": n(keys[6], (D_FF, D_MODEL), 0.1), "b2": jnp.zeros((1, D_MODEL), jnp.float32),
        "ln2_g": jnp.ones((1, D_MODEL), jnp.float32), "ln2_b": jnp.zeros((1, D_MODEL), jnp.float32),
        # classification head
        "wc": n(keys[7], (D_MODEL, N_CLASSES), 0.1), "bc": jnp.zeros((1, N_CLASSES), jnp.float32),
    }


def pack_inputs(params, pe, B, L, c_in):
    """One-time repack: bf16 weight slab + f32 bias/PE/mask slab.

    Everything that is a static function of (B, L) — tiled PE, block-diagonal
    attention mask, mean-pool matrix — is precomputed here, NOT in the kernel
    and NOT per forward call."""
    f32, bf16 = jnp.float32, jnp.bfloat16
    N = B * L
    out_rows = max(8, -(-B // 8) * 8)
    assert out_rows <= 16, "enlarge W_POOL section for larger batch"
    assert N % 8 == 0
    assert c_in <= 16

    # ---- bf16 weight slab (lane-padded to 128; 16-row-aligned sections) ----
    wslab = jnp.zeros((W_ROWS, LOGIT_PAD), f32)
    wslab = wslab.at[W_WE:W_WE + c_in, 0:D_MODEL].set(params["we"])
    wqkv = jnp.concatenate([params["wq"], params["wk"], params["wv"]], axis=1)   # (D, 3D)
    wslab = wslab.at[W_QKV:W_QKV + D_MODEL, 0:3 * D_MODEL].set(wqkv)
    for hd in range(N_HEADS):   # wo pre-split per head at 16-row-aligned slots
        wslab = wslab.at[W_WO + 16 * hd:W_WO + 16 * hd + D_HEAD, 0:D_MODEL].set(
            params["wo"][hd * D_HEAD:(hd + 1) * D_HEAD, :])
    wslab = wslab.at[W_W1:W_W1 + D_MODEL, 0:D_FF].set(params["w1"])
    wslab = wslab.at[W_W2:W_W2 + D_FF, 0:D_MODEL].set(params["w2"])
    wslab = wslab.at[W_WC:W_WC + D_MODEL, 0:N_CLASSES].set(params["wc"])
    # mean-pool matrix: pool[b, n] = 1/L iff row n belongs to batch b (pad rows zero)
    row_b = jnp.arange(out_rows, dtype=jnp.int32)[:, None]
    col_b = jnp.arange(N, dtype=jnp.int32)[None, :] // L
    pool = jnp.where((row_b == col_b) & (row_b < B), 1.0 / L, 0.0).astype(f32)
    wslab = wslab.at[W_POOL:W_POOL + out_rows, 0:N].set(pool)
    wslab = wslab.astype(bf16)

    # ---- f32 slab: biases / LN params + tiled PE(+emb bias) + block-diag mask ----
    fslab = jnp.zeros((F_BIAS_ROWS + 2 * N, LOGIT_PAD), f32)
    bqkv = jnp.concatenate([params["bq"], params["bk"], params["bv"]], axis=1)
    fslab = fslab.at[_R_BQKV, 0:3 * D_MODEL].set(bqkv[0])
    fslab = fslab.at[_R_BO, 0:D_MODEL].set(params["bo"][0])
    fslab = fslab.at[_R_G1, 0:D_MODEL].set(params["ln1_g"][0])
    fslab = fslab.at[_R_B1LN, 0:D_MODEL].set(params["ln1_b"][0])
    fslab = fslab.at[_R_B1, 0:D_FF].set(params["b1"][0])
    fslab = fslab.at[_R_B2, 0:D_MODEL].set(params["b2"][0])
    fslab = fslab.at[_R_G2, 0:D_MODEL].set(params["ln2_g"][0])
    fslab = fslab.at[_R_B2LN, 0:D_MODEL].set(params["ln2_b"][0])
    fslab = fslab.at[_R_BC, 0:N_CLASSES].set(params["bc"][0])
    pe_tiled = jnp.tile(pe + params["be"], (B, 1))                               # (N, D)
    fslab = fslab.at[F_BIAS_ROWS:F_BIAS_ROWS + N, 0:D_MODEL].set(pe_tiled)
    rb = jnp.arange(N, dtype=jnp.int32)[:, None] // L
    cb = jnp.arange(N, dtype=jnp.int32)[None, :] // L
    neg = jnp.where(rb == cb, 0.0, -1e30).astype(f32)
    fslab = fslab.at[F_BIAS_ROWS + N:F_BIAS_ROWS + 2 * N, 0:N].set(neg)
    return wslab, fslab


@jax.jit
def m01_isfm_forward(x, wslab, fslab):
    B, L, c_in = x.shape
    xf = x.reshape(B * L, c_in)               # flatten batch*seq rows (free in XLA)
    out_rows = max(8, -(-B // 8) * 8)
    logits_pad = fused_isfm_call(xf, wslab, fslab, out_rows)
    return logits_pad[:B, :N_CLASSES]


if __name__ == "__main__":
    B, L, C_IN = 2, 16, 4
    key = jax.random.PRNGKey(0)
    kx, kp = jax.random.split(key)
    x = jax.random.normal(kx, (B, L, C_IN), dtype=jnp.float32)
    params = init_params(kp, C_IN)
    pe = sinusoidal_pe(L, D_MODEL)
    wslab, fslab = pack_inputs(params, pe, B, L, C_IN)

    logits = m01_isfm_forward(x, wslab, fslab)
    jax.block_until_ready(logits)
    assert logits.shape == (B, N_CLASSES)
    assert bool(jnp.all(jnp.isfinite(logits)))
    print("KERNEL_OK")
</pallas_src>

<mosaic_0001>
module attributes {stable_mosaic.version = 11 : i64} {
  func.func @fused_isfm_kernel(%arg0: i32, %arg1: memref<32x4xf32, #tpu.memory_space<vmem>>, %arg2: memref<256x128xbf16, #tpu.memory_space<vmem>>, %arg3: memref<80x128xf32, #tpu.memory_space<vmem>>, %arg4: memref<8x128xf32, #tpu.memory_space<vmem>>) attributes {dimension_semantics = [#tpu.dimension_semantics<arbitrary>], iteration_bounds = array<i64: 1>, scalar_prefetch = 0 : i64, scratch_operands = 0 : i64, tpu.core_type = #tpu.core_type<tc>, window_params = [{pipeline_mode = #tpu.pipeline_mode<synchronous>, transform_indices = @transform_0, window_bounds = array<i64: 32, 4>}, {pipeline_mode = #tpu.pipeline_mode<synchronous>, transform_indices = @transform_1, window_bounds = array<i64: 256, 128>}, {pipeline_mode = #tpu.pipeline_mode<synchronous>, transform_indices = @transform_2, window_bounds = array<i64: 80, 128>}, {pipeline_mode = #tpu.pipeline_mode<synchronous>, transform_indices = @transform_3, window_bounds = array<i64: 8, 128>}]} {
    %c0 = arith.constant 0 : index
    %c0_0 = arith.constant 0 : index
    %0 = vector.load %arg2[%c0, %c0_0] : memref<256x128xbf16, #tpu.memory_space<vmem>>, vector<4x32xbf16>
    %c16 = arith.constant 16 : index
    %c0_1 = arith.constant 0 : index
    %1 = vector.load %arg2[%c16, %c0_1] : memref<256x128xbf16, #tpu.memory_space<vmem>>, vector<32x96xbf16>
    %c112 = arith.constant 112 : index
    %c0_2 = arith.constant 0 : index
    %2 = vector.load %arg2[%c112, %c0_2] : memref<256x128xbf16, #tpu.memory_space<vmem>>, vector<32x64xbf16>
    %c144 = arith.constant 144 : index
    %c0_3 = arith.constant 0 : index
    %3 = vector.load %arg2[%c144, %c0_3] : memref<256x128xbf16, #tpu.memory_space<vmem>>, vector<64x32xbf16>
    %c208 = arith.constant 208 : index
    %c0_4 = arith.constant 0 : index
    %4 = vector.load %arg2[%c208, %c0_4] : memref<256x128xbf16, #tpu.memory_space<vmem>>, vector<32x128xbf16>
    %c240 = arith.constant 240 : index
    %c0_5 = arith.constant 0 : index
    %5 = vector.load %arg2[%c240, %c0_5] : memref<256x128xbf16, #tpu.memory_space<vmem>>, vector<8x32xbf16>
    %c0_6 = arith.constant 0 : index
    %c0_7 = arith.constant 0 : index
    %6 = vector.load %arg3[%c0_6, %c0_7] : memref<80x128xf32, #tpu.memory_space<vmem>>, vector<16x128xf32>
    %7 = vector.extract_strided_slice %6 {offsets = [0, 0], sizes = [1, 96], strides = [1, 1]} : vector<16x128xf32> to vector<1x96xf32>
    %8 = vector.extract_strided_slice %6 {offsets = [1, 0], sizes = [1, 32], strides = [1, 1]} : vector<16x128xf32> to vector<1x32xf32>
    %9 = vector.extract_strided_slice %6 {offsets = [2, 0], sizes = [1, 32], strides = [1, 1]} : vector<16x128xf32> to vector<1x32xf32>
    %10 = vector.extract_strided_slice %6 {offsets = [3, 0], sizes = [1, 32], strides = [1, 1]} : vector<16x128xf32> to vector<1x32xf32>
    %11 = vector.extract_strided_slice %6 {offsets = [4, 0], sizes = [1, 64], strides = [1, 1]} : vector<16x128xf32> to vector<1x64xf32>
    %12 = vector.extract_strided_slice %6 {offsets = [5, 0], sizes = [1, 32], strides = [1, 1]} : vector<16x128xf32> to vector<1x32xf32>
    %13 = vector.extract_strided_slice %6 {offsets = [6, 0], sizes = [1, 32], strides = [1, 1]} : vector<16x128xf32> to vector<1x32xf32>
    %14 = vector.extract_strided_slice %6 {offsets = [7, 0], sizes = [1, 32], strides = [1, 1]} : vector<16x128xf32> to vector<1x32xf32>
    %15 = vector.extract_strided_slice %6 {offsets = [8, 0], sizes = [1, 128], strides = [1, 1]} : vector<16x128xf32> to vector<1x128xf32>
    %c16_8 = arith.constant 16 : index
    %c0_9 = arith.constant 0 : index
    %16 = vector.load %arg3[%c16_8, %c0_9] : memref<80x128xf32, #tpu.memory_space<vmem>>, vector<32x32xf32>
    %c48 = arith.constant 48 : index
    %c0_10 = arith.constant 0 : index
    %17 = vector.load %arg3[%c48, %c0_10] : memref<80x128xf32, #tpu.memory_space<vmem>>, vector<32x32xf32>
    %c0_11 = arith.constant 0 : index
    %c0_12 = arith.constant 0 : index
    %18 = vector.load %arg1[%c0_11, %c0_12] : memref<32x4xf32, #tpu.memory_space<vmem>>, vector<32x4xf32>
    %19 = arith.truncf %18 : vector<32x4xf32> to vector<32x4xbf16>
    %cst = arith.constant dense<0.000000e+00> : vector<32x32xf32>
    %20 = tpu.matmul %19, %0, %cst {dimension_numbers = #tpu.dot_dimension_numbers<[1], [0], [0], [1], [0, 0, 1, 1], [], []>} : vector<32x4xbf16>, vector<4x32xbf16>, vector<32x32xf32> -> vector<32x32xf32>
    %21 = arith.addf %20, %16 : vector<32x32xf32>
    %22 = arith.truncf %21 : vector<32x32xf32> to vector<32x32xbf16>
    %cst_13 = arith.constant dense<0.000000e+00> : vector<32x96xf32>
    %23 = tpu.matmul %22, %1, %cst_13 {dimension_numbers = #tpu.dot_dimension_numbers<[1], [0], [0], [1], [0, 0, 1, 1], [], []>} : vector<32x32xbf16>, vector<32x96xbf16>, vector<32x96xf32> -> vector<32x96xf32>
    %24 = vector.broadcast %7 : vector<1x96xf32> to vector<32x96xf32>
    %25 = arith.addf %23, %24 : vector<32x96xf32>
    %26 = arith.truncf %25 : vector<32x96xf32> to vector<32x96xbf16>
    %27 = vector.extract_strided_slice %26 {offsets = [0, 0], sizes = [32, 8], strides = [1, 1]} : vector<32x96xbf16> to vector<32x8xbf16>
    %28 = vector.extract_strided_slice %26 {offsets = [0, 32], sizes = [32, 8], strides = [1, 1]} : vector<32x96xbf16> to vector<32x8xbf16>
    %cst_14 = arith.constant dense<0.000000e+00> : vector<32x32xf32>
    %29 = tpu.matmul %27, %28, %cst_14 {dimension_numbers = #tpu.dot_dimension_numbers<[1], [1], [0], [0], [0, 0, 1, 0], [], []>} : vector<32x8xbf16>, vector<32x8xbf16>, vector<32x32xf32> -> vector<32x32xf32>
    %cst_15 = arith.constant 0.353553385 : f32
    %30 = vector.broadcast %cst_15 : f32 to vector<32x32xf32>
    %31 = arith.mulf %29, %30 : vector<32x32xf32>
    %32 = arith.addf %31, %17 : vector<32x32xf32>
    %33 = vector.extract_strided_slice %26 {offsets = [0, 8], sizes = [32, 8], strides = [1, 1]} : vector<32x96xbf16> to vector<32x8xbf16>
    %34 = vector.extract_strided_slice %26 {offsets = [0, 40], sizes = [32, 8], strides = [1, 1]} : vector<32x96xbf16> to vector<32x8xbf16>
    %cst_16 = arith.constant dense<0.000000e+00> : vector<32x32xf32>
    %35 = tpu.matmul %33, %34, %cst_16 {dimension_numbers = #tpu.dot_dimension_numbers<[1], [1], [0], [0], [0, 0, 1, 0], [], []>} : vector<32x8xbf16>, vector<32x8xbf16>, vector<32x32xf32> -> vector<32x32xf32>
    %cst_17 = arith.constant 0.353553385 : f32
    %36 = vector.broadcast %cst_17 : f32 to vector<32x32xf32>
    %37 = arith.mulf %35, %36 : vector<32x32xf32>
    %38 = arith.addf %37, %17 : vector<32x32xf32>
    %39 = vector.extract_strided_slice %26 {offsets = [0, 16], sizes = [32, 8], strides = [1, 1]} : vector<32x96xbf16> to vector<32x8xbf16>
    %40 = vector.extract_strided_slice %26 {offsets = [0, 48], sizes = [32, 8], strides = [1, 1]} : vector<32x96xbf16> to vector<32x8xbf16>
    %cst_18 = arith.constant dense<0.000000e+00> : vector<32x32xf32>
    %41 = tpu.matmul %39, %40, %cst_18 {dimension_numbers = #tpu.dot_dimension_numbers<[1], [1], [0], [0], [0, 0, 1, 0], [], []>} : vector<32x8xbf16>, vector<32x8xbf16>, vector<32x32xf32> -> vector<32x32xf32>
    %cst_19 = arith.constant 0.353553385 : f32
    %42 = vector.broadcast %cst_19 : f32 to vector<32x32xf32>
    %43 = arith.mulf %41, %42 : vector<32x32xf32>
    %44 = arith.addf %43, %17 : vector<32x32xf32>
    %45 = vector.extract_strided_slice %26 {offsets = [0, 24], sizes = [32, 8], strides = [1, 1]} : vector<32x96xbf16> to vector<32x8xbf16>
    %46 = vector.extract_strided_slice %26 {offsets = [0, 56], sizes = [32, 8], strides = [1, 1]} : vector<32x96xbf16> to vector<32x8xbf16>
    %cst_20 = arith.constant dense<0.000000e+00> : vector<32x32xf32>
    %47 = tpu.matmul %45, %46, %cst_20 {dimension_numbers = #tpu.dot_dimension_numbers<[1], [1], [0], [0], [0, 0, 1, 0], [], []>} : vector<32x8xbf16>, vector<32x8xbf16>, vector<32x32xf32> -> vector<32x32xf32>
    %cst_21 = arith.constant 0.353553385 : f32
    %48 = vector.broadcast %cst_21 : f32 to vector<32x32xf32>
    %49 = arith.mulf %47, %48 : vector<32x32xf32>
    %50 = arith.addf %49, %17 : vector<32x32xf32>
    %51 = tpu.concatenate %32, %38, %44, %50 in 0 : vector<32x32xf32>, vector<32x32xf32>, vector<32x32xf32>, vector<32x32xf32> -> vector<128x32xf32>
    %cst_22 = arith.constant dense<0xFF800000> : vector<128xf32>
    %52 = vector.multi_reduction <maximumf>, %51, %cst_22 [1] : vector<128x32xf32> to vector<128xf32>
    %53 = vector.shape_cast %52 : vector<128xf32> to vector<128x1xf32>
    %54 = vector.broadcast %53 : vector<128x1xf32> to vector<128x32xf32>
    %55 = arith.subf %51, %54 : vector<128x32xf32>
    %56 = math.exp %55 : vector<128x32xf32>
    %cst_23 = arith.constant dense<0.000000e+00> : vector<128xf32>
    %57 = vector.multi_reduction <add>, %56, %cst_23 [1] : vector<128x32xf32> to vector<128xf32>
    %58 = vector.shape_cast %57 : vector<128xf32> to vector<128x1xf32>
    %59 = tpu.reciprocal %58 {approx = true} : vector<128x1xf32> -> vector<128x1xf32>
    %60 = vector.broadcast %59 : vector<128x1xf32> to vector<128x32xf32>
    %61 = arith.mulf %56, %60 : vector<128x32xf32>
    %62 = arith.truncf %61 : vector<128x32xf32> to vector<128x32xbf16>
    %63 = vector.extract_strided_slice %62 {offsets = [0, 0], sizes = [32, 32], strides = [1, 1]} : vector<128x32xbf16> to vector<32x32xbf16>
    %64 = vector.extract_strided_slice %26 {offsets = [0, 64], sizes = [32, 8], strides = [1, 1]} : vector<32x96xbf16> to vector<32x8xbf16>
    %cst_24 = arith.constant dense<0.000000e+00> : vector<32x8xf32>
    %65 = tpu.matmul %63, %64, %cst_24 {dimension_numbers = #tpu.dot_dimension_numbers<[1], [0], [0], [1], [0, 0, 1, 1], [], []>} : vector<32x32xbf16>, vector<32x8xbf16>, vector<32x8xf32> -> vector<32x8xf32>
    %c48_25 = arith.constant 48 : index
    %c0_26 = arith.constant 0 : index
    %66 = vector.load %arg2[%c48_25, %c0_26] : memref<256x128xbf16, #tpu.memory_space<vmem>>, vector<8x32xbf16>
    %67 = arith.truncf %65 : vector<32x8xf32> to vector<32x8xbf16>
    %cst_27 = arith.constant dense<0.000000e+00> : vector<32x32xf32>
    %68 = tpu.matmul %67, %66, %cst_27 {dimension_numbers = #tpu.dot_dimension_numbers<[1], [0], [0], [1], [0, 0, 1, 1], [], []>} : vector<32x8xbf16>, vector<8x32xbf16>, vector<32x32xf32> -> vector<32x32xf32>
    %69 = vector.extract_strided_slice %62 {offsets = [32, 0], sizes = [32, 32], strides = [1, 1]} : vector<128x32xbf16> to vector<32x32xbf16>
    %70 = vector.extract_strided_slice %26 {offsets = [0, 72], sizes = [32, 8], strides = [1, 1]} : vector<32x96xbf16> to vector<32x8xbf16>
    %cst_28 = arith.constant dense<0.000000e+00> : vector<32x8xf32>
    %71 = tpu.matmul %69, %70, %cst_28 {dimension_numbers = #tpu.dot_dimension_numbers<[1], [0], [0], [1], [0, 0, 1, 1], [], []>} : vector<32x32xbf16>, vector<32x8xbf16>, vector<32x8xf32> -> vector<32x8xf32>
    %c64 = arith.constant 64 : index
    %c0_29 = arith.constant 0 : index
    %72 = vector.load %arg2[%c64, %c0_29] : memref<256x128xbf16, #tpu.memory_space<vmem>>, vector<8x32xbf16>
    %73 = arith.truncf %71 : vector<32x8xf32> to vector<32x8xbf16>
    %cst_30 = arith.constant dense<0.000000e+00> : vector<32x32xf32>
    %74 = tpu.matmul %73, %72, %cst_30 {dimension_numbers = #tpu.dot_dimension_numbers<[1], [0], [0], [1], [0, 0, 1, 1], [], []>} : vector<32x8xbf16>, vector<8x32xbf16>, vector<32x32xf32> -> vector<32x32xf32>
    %75 = arith.addf %68, %74 : vector<32x32xf32>
    %76 = vector.extract_strided_slice %62 {offsets = [64, 0], sizes = [32, 32], strides = [1, 1]} : vector<128x32xbf16> to vector<32x32xbf16>
    %77 = vector.extract_strided_slice %26 {offsets = [0, 80], sizes = [32, 8], strides = [1, 1]} : vector<32x96xbf16> to vector<32x8xbf16>
    %cst_31 = arith.constant dense<0.000000e+00> : vector<32x8xf32>
    %78 = tpu.matmul %76, %77, %cst_31 {dimension_numbers = #tpu.dot_dimension_numbers<[1], [0], [0], [1], [0, 0, 1, 1], [], []>} : vector<32x32xbf16>, vector<32x8xbf16>, vector<32x8xf32> -> vector<32x8xf32>
    %c80 = arith.constant 80 : index
    %c0_32 = arith.constant 0 : index
    %79 = vector.load %arg2[%c80, %c0_32] : memref<256x128xbf16, #tpu.memory_space<vmem>>, vector<8x32xbf16>
    %80 = arith.truncf %78 : vector<32x8xf32> to vector<32x8xbf16>
    %cst_33 = arith.constant dense<0.000000e+00> : vector<32x32xf32>
    %81 = tpu.matmul %80, %79, %cst_33 {dimension_numbers = #tpu.dot_dimension_numbers<[1], [0], [0], [1], [0, 0, 1, 1], [], []>} : vector<32x8xbf16>, vector<8x32xbf16>, vector<32x32xf32> -> vector<32x32xf32>
    %82 = arith.addf %75, %81 : vector<32x32xf32>
    %83 = vector.extract_strided_slice %62 {offsets = [96, 0], sizes = [32, 32], strides = [1, 1]} : vector<128x32xbf16> to vector<32x32xbf16>
    %84 = vector.extract_strided_slice %26 {offsets = [0, 88], sizes = [32, 8], strides = [1, 1]} : vector<32x96xbf16> to vector<32x8xbf16>
    %cst_34 = arith.constant dense<0.000000e+00> : vector<32x8xf32>
    %85 = tpu.matmul %83, %84, %cst_34 {dimension_numbers = #tpu.dot_dimension_numbers<[1], [0], [0], [1], [0, 0, 1, 1], [], []>} : vector<32x32xbf16>, vector<32x8xbf16>, vector<32x8xf32> -> vector<32x8xf32>
    %c96 = arith.constant 96 : index
    %c0_35 = arith.constant 0 : index
    %86 = vector.load %arg2[%c96, %c0_35] : memref<256x128xbf16, #tpu.memory_space<vmem>>, vector<8x32xbf16>
    %87 = arith.truncf %85 : vector<32x8xf32> to vector<32x8xbf16>
    %cst_36 = arith.constant dense<0.000000e+00> : vector<32x32xf32>
    %88 = tpu.matmul %87, %86, %cst_36 {dimension_numbers = #tpu.dot_dimension_numbers<[1], [0], [0], [1], [0, 0, 1, 1], [], []>} : vector<32x8xbf16>, vector<8x32xbf16>, vector<32x32xf32> -> vector<32x32xf32>
    %89 = arith.addf %82, %88 : vector<32x32xf32>
    %90 = vector.broadcast %8 : vector<1x32xf32> to vector<32x32xf32>
    %91 = arith.addf %89, %90 : vector<32x32xf32>
    %92 = arith.addf %21, %91 : vector<32x32xf32>
    %cst_37 = arith.constant dense<0.000000e+00> : vector<32xf32>
    %93 = vector.multi_reduction <add>, %92, %cst_37 [1] : vector<32x32xf32> to vector<32xf32>
    %94 = vector.shape_cast %93 : vector<32xf32> to vector<32x1xf32>
    %cst_38 = arith.constant 3.200000e+01 : f32
    %95 = vector.broadcast %cst_38 : f32 to vector<32x1xf32>
    %96 = arith.divf %94, %95 : vector<32x1xf32>
    %97 = vector.broadcast %96 : vector<32x1xf32> to vector<32x32xf32>
    %98 = arith.subf %92, %97 : vector<32x32xf32>
    %99 = arith.mulf %98, %98 : vector<32x32xf32>
    %cst_39 = arith.constant dense<0.000000e+00> : vector<32xf32>
    %100 = vector.multi_reduction <add>, %99, %cst_39 [1] : vector<32x32xf32> to vector<32xf32>
    %101 = vector.shape_cast %100 : vector<32xf32> to vector<32x1xf32>
    %cst_40 = arith.constant 3.200000e+01 : f32
    %102 = vector.broadcast %cst_40 : f32 to vector<32x1xf32>
    %103 = arith.divf %101, %102 : vector<32x1xf32>
    %104 = vector.broadcast %96 : vector<32x1xf32> to vector<32x32xf32>
    %105 = arith.subf %92, %104 : vector<32x32xf32>
    %cst_41 = arith.constant 9.99999974E-6 : f32
    %106 = vector.broadcast %cst_41 : f32 to vector<32x1xf32>
    %107 = arith.addf %103, %106 : vector<32x1xf32>
    %108 = math.rsqrt %107 : vector<32x1xf32>
    %109 = vector.broadcast %108 : vector<32x1xf32> to vector<32x32xf32>
    %110 = arith.mulf %105, %109 : vector<32x32xf32>
    %111 = vector.broadcast %9 : vector<1x32xf32> to vector<32x32xf32>
    %112 = arith.mulf %110, %111 : vector<32x32xf32>
    %113 = vector.broadcast %10 : vector<1x32xf32> to vector<32x32xf32>
    %114 = arith.addf %112, %113 : vector<32x32xf32>
    %115 = arith.truncf %114 : vector<32x32xf32> to vector<32x32xbf16>
    %cst_42 = arith.constant dense<0.000000e+00> : vector<32x64xf32>
    %116 = tpu.matmul %115, %2, %cst_42 {dimension_numbers = #tpu.dot_dimension_numbers<[1], [0], [0], [1], [0, 0, 1, 1], [], []>} : vector<32x32xbf16>, vector<32x64xbf16>, vector<32x64xf32> -> vector<32x64xf32>
    %117 = vector.broadcast %11 : vector<1x64xf32> to vector<32x64xf32>
    %118 = arith.addf %116, %117 : vector<32x64xf32>
    %cst_43 = arith.constant 0.000000e+00 : f32
    %119 = vector.broadcast %cst_43 : f32 to vector<32x64xf32>
    %120 = arith.maximumf %118, %119 : vector<32x64xf32>
    %121 = arith.truncf %120 : vector<32x64xf32> to vector<32x64xbf16>
    %cst_44 = arith.constant dense<0.000000e+00> : vector<32x32xf32>
    %122 = tpu.matmul %121, %3, %cst_44 {dimension_numbers = #tpu.dot_dimension_numbers<[1], [0], [0], [1], [0, 0, 1, 1], [], []>} : vector<32x64xbf16>, vector<64x32xbf16>, vector<32x32xf32> -> vector<32x32xf32>
    %123 = vector.broadcast %12 : vector<1x32xf32> to vector<32x32xf32>
    %124 = arith.addf %122, %123 : vector<32x32xf32>
    %125 = arith.addf %114, %124 : vector<32x32xf32>
    %cst_45 = arith.constant dense<0.000000e+00> : vector<32xf32>
    %126 = vector.multi_reduction <add>, %125, %cst_45 [1] : vector<32x32xf32> to vector<32xf32>
    %127 = vector.shape_cast %126 : vector<32xf32> to vector<32x1xf32>
    %cst_46 = arith.constant 3.200000e+01 : f32
    %128 = vector.broadcast %cst_46 : f32 to vector<32x1xf32>
    %129 = arith.divf %127, %128 : vector<32x1xf32>
    %130 = vector.broadcast %129 : vector<32x1xf32> to vector<32x32xf32>
    %131 = arith.subf %125, %130 : vector<32x32xf32>
    %132 = arith.mulf %131, %131 : vector<32x32xf32>
    %cst_47 = arith.constant dense<0.000000e+00> : vector<32xf32>
    %133 = vector.multi_reduction <add>, %132, %cst_47 [1] : vector<32x32xf32> to vector<32xf32>
    %134 = vector.shape_cast %133 : vector<32xf32> to vector<32x1xf32>
    %cst_48 = arith.constant 3.200000e+01 : f32
    %135 = vector.broadcast %cst_48 : f32 to vector<32x1xf32>
    %136 = arith.divf %134, %135 : vector<32x1xf32>
    %137 = vector.broadcast %129 : vector<32x1xf32> to vector<32x32xf32>
    %138 = arith.subf %125, %137 : vector<32x32xf32>
    %cst_49 = arith.constant 9.99999974E-6 : f32
    %139 = vector.broadcast %cst_49 : f32 to vector<32x1xf32>
    %140 = arith.addf %136, %139 : vector<32x1xf32>
    %141 = math.rsqrt %140 : vector<32x1xf32>
    %142 = vector.broadcast %141 : vector<32x1xf32> to vector<32x32xf32>
    %143 = arith.mulf %138, %142 : vector<32x32xf32>
    %144 = vector.broadcast %13 : vector<1x32xf32> to vector<32x32xf32>
    %145 = arith.mulf %143, %144 : vector<32x32xf32>
    %146 = vector.broadcast %14 : vector<1x32xf32> to vector<32x32xf32>
    %147 = arith.addf %145, %146 : vector<32x32xf32>
    %148 = arith.truncf %147 : vector<32x32xf32> to vector<32x32xbf16>
    %cst_50 = arith.constant dense<0.000000e+00> : vector<8x32xf32>
    %149 = tpu.matmul %5, %148, %cst_50 {dimension_numbers = #tpu.dot_dimension_numbers<[1], [0], [0], [1], [0, 0, 1, 1], [], []>} : vector<8x32xbf16>, vector<32x32xbf16>, vector<8x32xf32> -> vector<8x32xf32>
    %150 = arith.truncf %149 : vector<8x32xf32> to vector<8x32xbf16>
    %cst_51 = arith.constant dense<0.000000e+00> : vector<8x128xf32>
    %151 = tpu.matmul %150, %4, %cst_51 {dimension_numbers = #tpu.dot_dimension_numbers<[1], [0], [0], [1], [0, 0, 1, 1], [], []>} : vector<8x32xbf16>, vector<32x128xbf16>, vector<8x128xf32> -> vector<8x128xf32>
    %152 = vector.broadcast %15 : vector<1x128xf32> to vector<8x128xf32>
    %153 = arith.addf %151, %152 : vector<8x128xf32>
    %c0_52 = arith.constant 0 : index
    %c0_53 = arith.constant 0 : index
    %154 = vector.load %arg4[%c0_52, %c0_53] : memref<8x128xf32, #tpu.memory_space<vmem>>, vector<8x128xf32>
    tpu.vector_store %arg4[%c0_52, %c0_53], %153 {strides = array<i32>} : memref<8x128xf32, #tpu.memory_space<vmem>>, vector<8x128xf32>,
    return
  }
  func.func @transform_0(%arg0: i32) -> (i32, i32) {
    %c0_i32 = arith.constant 0 : i32
    %c0_i32_0 = arith.constant 0 : i32
    %c0_i32_1 = arith.constant 0 : i32
    return %c0_i32, %c0_i32_0 : i32, i32
  }
  func.func @transform_1(%arg0: i32) -> (i32, i32) {
    %c0_i32 = arith.constant 0 : i32
    %c0_i32_0 = arith.constant 0 : i32
    %c0_i32_1 = arith.constant 0 : i32
    return %c0_i32, %c0_i32_0 : i32, i32
  }
  func.func @transform_2(%arg0: i32) -> (i32, i32) {
    %c0_i32 = arith.constant 0 : i32
    %c0_i32_0 = arith.constant 0 : i32
    %c0_i32_1 = arith.constant 0 : i32
    return %c0_i32, %c0_i32_0 : i32, i32
  }
  func.func @transform_3(%arg0: i32) -> (i32, i32) {
    %c0_i32 = arith.constant 0 : i32
    %c0_i32_0 = arith.constant 0 : i32
    %c0_i32_1 = arith.constant 0 : i32
    return %c0_i32, %c0_i32_0 : i32, i32
  }
}

</mosaic_0001>

<bundles_post_ra>
// kernel: m01_isfm_forward.1
= control target key start
LH: loop header
LB: loop body
LE: loop exit
PB: predicated region body
PF: predicated region fallthrough
CT: control target
= control target key end

     0   :  { %8 = vsyncpa [#allocation3], 0  ;;  %s1858_s0 = inlined_call_operand.vmem [shape: f32[32,4], index: 0, kind: input, shape index: {}]   ;;  %s1859_s1 = inlined_call_operand.hbm [shape: bf16[256,128], index: 1, kind: input, shape index: {}]   ;;  %s1860_s2 = inlined_call_operand.hbm [shape: f32[80,128], index: 2, kind: input, shape index: {}]   ;;  %s1861_s3 = inlined_call_operand.vmem [shape: f32[8,128], index: 3, kind: output, shape index: {}]  }
   0x1   :  { %s16_s14 = sshll.u32 %s1859_s1, 4  ;;  %s17_s14 = int_to_ptr.hbm [resolvable:$true] %s16_s14 }
   0x2   :  { %9 = vsyncpa [#allocation5], 0  ;;  %s1448_s15 = smov [#allocation2]   ;;  %s29_s19 = sshll.u32 %s1860_s2, 4  ;;  %s30_s19 = int_to_ptr.hbm [resolvable:$true] %s29_s19 }
   0x3   :  { %s18_s16 = sshll.u32 %s1448_s15, 4  ;;  %s1449_s20 = smov 64   ;;  %s19_s16 = int_to_ptr.vmem [resolvable:$true] %s18_s16 }
   0x4   :  { %s1450_s21 = smov 4   ;;  %s1451_s22 = smov [#allocation4]  }
   0x5   :  { %24 = dma.hbm_to_vmem [thread:$0]  %s17_s14, 2048, %s19_s16, [#allocation3], %s1449_s20, %s1449_s20, %s1450_s21  }
   0x6   :  { %s31_s23 = sshll.u32 %s1451_s22, 4  ;;  %s1452_s24 = smov 128   ;;  %s32_s23 = int_to_ptr.vmem [resolvable:$true] %s31_s23 }
   0x7   :  { %s1453_s1 = smov 8  }
   0x8   :  { %37 = dma.hbm_to_vmem [thread:$0]  %s30_s19, 1280, %s32_s23, [#allocation5], %s1452_s24, %s1452_s24, %s1453_s1  }
   0x9   :  { %1444 = dma.done.wait [#allocation3], 2048  }
   0xa   :  { %1445 = vsyncadd [#allocation3], 4294965248 }
   0xb   :  { %1446 = dma.done.wait [#allocation5], 1280  }
   0xc   :  { %1447 = vsyncadd [#allocation5], 4294966016  ;;  %vm92_vm0 = vcmask 1041408   ;;  %v47_v0 = vld [vmem:[#allocation2] sm:$0x3]  ;;  %v80_v2 = vld [vmem:[%s1858_s0 + $0x8] sm:$0xff] }
   0xd   :  { %v79_v1 = vld [vmem:[%s1858_s0] sm:$0xff]  ;;  %v94_v3 = vsel %vm92_vm0, %v47_v0, 0  ;;  %vm85_vm1 = vcmask 31744   ;;  %v81_v5 = vld [vmem:[%s1858_s0 + $0x10] sm:$0xff]  ;;  %v82_v6 = vld [vmem:[%s1858_s0 + $0x18] sm:$0xff]  ;;  %vm130_vm2 = vcmask 261120  }
   0xe   :  { %v83_v4 = vpack.c.bf16 %v80_v2, %v79_v1  ;;  %103 = vmatpush.bf16.msra.mxu0 %v94_v3  ;;  %v84_v7 = vpack.c.bf16 %v82_v6, %v81_v5  ;;  %v1287_v8 = vld [vmem:[#allocation2 + $0x10] sm:$0xff]  ;;  %v1286_v9 = vld [vmem:[#allocation2 + $0x8] sm:$0xff]  ;;  %v72_v12 = vld [vmem:[#allocation4 + $0x18] sm:$0xff]  ;;  %s1454_s0 = smov 120   ;;  %s1455_s5 = smov 96   ;;  %vm174_vm3 = vcmask 64512  }
   0xf   :  { %143 = vmatpush.bf16.msra.mxu1 %v1287_v8  ;;  %v71_v11 = vld [vmem:[#allocation4 + $0x10] sm:$0xff]  ;;  %v73_v18 = vld [vmem:[#allocation4 + $0x20] sm:$0xff]  ;;  %v74_v19 = vld [vmem:[#allocation4 + $0x28] sm:$0xff]  ;;  %s1456_s6 = smov 88   ;;  %s1457_s7 = smov 80   ;;  %vm641_vm4 = vcmask 1043456  }
  0x10   :  { %v1519_v24 = vld [vmem:[#allocation4] sm:$0xff]  ;;  %s1458_s8 = smov 104   ;;  %s1459_s9 = smov 72  }
  0x11   :  { %1212 = vmatmul.msk.bf16.vlgmr.msra.gmra.mxu0 %vm85_vm1, %v83_v4  ;;  %v117_v26 = vperm.slane %v1519_v24, 0  ;;  %s1460_s10 = smov 112   ;;  %v1558_v4 = vld [vmem:[#allocation4 + $0x38] sm:$0xff]  ;;  %v1563_v8 = vld [vmem:[#allocation4 + $0x40] sm:$0xff]  ;;  %s1461_s11 = smov 56  }
  0x12   :  { %s1462_s12 = smov 48   ;;  %s1463_s13 = smov 40  }
  0x13   :  { %144 = vmatpush.bf16.msra.mxu1 %v1286_v9 }
  0x21   :  { %1213 = vmatmul.msk.bf16.gmra.mxu0 %vm85_vm1, %v84_v7 }
  0x8e   :  { %v105_v10 = vpop.f32.mrf.mxu0 }
  0x8f   :  { %v1505_v14 = vadd.f32 %v105_v10, %v71_v11 }
  0x96   :  { %v107_v13 = vpop.f32.mrf.mxu0 }
  0x97   :  { %v1507_v15 = vadd.f32 %v107_v13, %v72_v12  ;;  %v1568_v13 = vld [vmem:[#allocation4 + $0x30] sm:$0xff] }
  0x99   :  { %v115_v16 = vpack.c.bf16 %v1507_v15, %v1505_v14 }
  0x9b   :  { %1222 = vmatmul.msk.bf16.vlgmr.msra.gmra.mxu1 %vm130_vm2, %v115_v16 }
  0x9e   :  { %v110_v17 = vpop.f32.mrf.mxu0 }
  0x9f   :  { %v1512_v21 = vadd.f32 %v110_v17, %v73_v18 }
  0xa6   :  { %v112_v20 = vpop.f32.mrf.mxu0 }
  0xa7   :  { %v1514_v22 = vadd.f32 %v112_v20, %v74_v19 }
  0xa9   :  { %v116_v23 = vpack.c.bf16 %v1514_v22, %v1512_v21 }
  0xab   :  { %1223 = vmatmul.msk.bf16.gmra.mxu1 %vm130_vm2, %v116_v23 }
 0x118   :  { %v146_v25 = vpop.f32.mrf.mxu1 }
 0x119   :  { %v147_v27 = vadd.f32 %v146_v25, %v117_v26 }
 0x11b   :  { %v156_v29 = vpack.c.bf16 %v147_v27, %v147_v27 }
 0x11d   :  { %v164_v32 = vunpack.c.l.b16 %v156_v29 }
 0x120   :  { %v148_v28 = vpop.f32.mrf.mxu1 }
 0x121   :  { %v149_v30 = vadd.f32 %v148_v28, %v117_v26 }
 0x123   :  { %v157_v31 = vpack.c.bf16 %v149_v30, %v149_v30 }
 0x125   :  { %v165_v33 = vunpack.c.l.b16 %v157_v31 }
 0x127   :  { %v1522_v34 = vpack.c.b16 %v165_v33, %v164_v32 }
 0x128   :  { %v151_v35 = vpop.f32.mrf.mxu1 }
 0x129   :  { %214 = vrot.lane.b32.xlu1 %v1522_v34, %s1454_s0  ;;  %v152_v36 = vadd.f32 %v151_v35, %v117_v26  ;;  %v1579_v35 = vld [vmem:[#allocation4 + $0x48] sm:$0xff] }
 0x12b   :  { %v158_v38 = vpack.c.bf16 %v152_v36, %v152_v36 }
 0x12d   :  { %v166_v41 = vunpack.c.l.b16 %v158_v38 }
 0x130   :  { %v153_v37 = vpop.f32.mrf.mxu1 }
 0x131   :  { %v154_v39 = vadd.f32 %v153_v37, %v117_v26 }
 0x133   :  { %v159_v40 = vpack.c.bf16 %v154_v39, %v154_v39 }
 0x135   :  { %v167_v42 = vunpack.c.l.b16 %v159_v40 }
 0x137   :  { %v1525_v43 = vpack.c.b16 %v167_v42, %v166_v41 }
 0x139   :  { %172 = vrot.lane.b32.xlu2 %v1525_v43, %s1455_s5  ;;  %220 = vrot.lane.b32.xlu0 %v1525_v43, %s1456_s6 }
 0x13a   :  { %216 = vrot.lane.b32.xlu1 %v1525_v43, %s1454_s0 }
 0x141   :  { %170 = vrot.lane.b32.xlu2 %v1522_v34, %s1455_s5  ;;  %218 = vrot.lane.b32.xlu0 %v1522_v34, %s1456_s6 }
 0x142   :  { %265 = vrot.lane.b32.xlu1 %v1522_v34, %s1457_s7 }
 0x149   :  { %308 = vrot.lane.b32.xlu2 %v1522_v34, %s1458_s8  ;;  %267 = vrot.lane.b32.xlu0 %v1525_v43, %s1457_s7 }
 0x14a   :  { %312 = vrot.lane.b32.xlu1 %v1522_v34, %s1459_s9 }
 0x151   :  { %314 = vrot.lane.b32.xlu2 %v1525_v43, %s1459_s9  ;;  %261 = vrot.lane.b32.xlu0 %v1522_v34, %s1460_s10 }
 0x159   :  { %263 = vrot.lane.b32.xlu0 %v1525_v43, %s1460_s10 }
 0x161   :  { %310 = vrot.lane.b32.xlu0 %v1525_v43, %s1458_s8 }
 0x193   :  { %v173_v44 = vpop.permute.xlu2 %172 }
 0x194   :  { %v185_v45 = vsel %vm174_vm3, %v173_v44, 0 }
 0x195   :  { %193 = vmatpush.bf16.xpose.msra.mxu2 %v185_v45 }
 0x19b   :  { %v171_v46 = vpop.permute.xlu2 %170  ;;  %v215_v49 = vpop.permute.xlu1 %214 }
 0x19c   :  { %v182_v47 = vsel %vm174_vm3, %v171_v46, 0 }
 0x19d   :  { %194 = vmatpush.bf16.xpose.msra.mxu2 %v182_v47 }
 0x1a3   :  { %v309_v48 = vpop.permute.xlu2 %308 }
 0x1a4   :  { %1224 = vmatmul.msk.bf16.vlgmr.msra.gmra.mxu2 %vm174_vm3, %v1522_v34 }
 0x1ab   :  { %v221_v50 = vpop.permute.xlu0 %220  ;;  %v315_v51 = vpop.permute.xlu2 %314 }
 0x1ac   :  { %v217_v52 = vpop.permute.xlu1 %216  ;;  %v232_v53 = vsel %vm174_vm3, %v221_v50, 0  ;;  %v326_v54 = vsel %vm174_vm3, %v315_v51, 0 }
 0x1ad   :  { %240 = vmatpush.bf16.xpose.msra.mxu3 %v232_v53  ;;  %334 = vmatpush.bf16.xpose.msrb.mxu1 %v326_v54 }
 0x1b3   :  { %v219_v55 = vpop.permute.xlu0 %218 }
 0x1b4   :  { %v266_v56 = vpop.permute.xlu1 %265  ;;  %1225 = vmatmul.msk.bf16.gmra.mxu2 %vm174_vm3, %v1525_v43  ;;  %v229_v57 = vsel %vm174_vm3, %v219_v55, 0 }
 0x1b5   :  { %241 = vmatpush.bf16.xpose.msra.mxu3 %v229_v57  ;;  %v276_v63 = vsel %vm174_vm3, %v266_v56, 0 }
 0x1bb   :  { %v268_v58 = vpop.permute.xlu0 %267 }
 0x1bc   :  { %v313_v59 = vpop.permute.xlu1 %312  ;;  %1226 = vmatmul.msk.bf16.vlgmr.msra.gmra.mxu3 %vm174_vm3, %v215_v49  ;;  %v279_v60 = vsel %vm174_vm3, %v268_v58, 0 }
 0x1bd   :  { %287 = vmatpush.bf16.xpose.msrb.mxu0 %v279_v60  ;;  %v323_v61 = vsel %vm174_vm3, %v313_v59, 0 }
 0x1be   :  { %335 = vmatpush.bf16.xpose.msrb.mxu1 %v323_v61 }
 0x1c3   :  { %v262_v62 = vpop.permute.xlu0 %261 }
 0x1c5   :  { %1230 = vmatmul.msk.bf16.vlgmr.msrb.gmra.mxu1 %vm174_vm3, %v309_v48  ;;  %288 = vmatpush.bf16.xpose.msrb.mxu0 %v276_v63 }
 0x1cb   :  { %v264_v0 = vpop.permute.xlu0 %263 }
 0x1cc   :  { %1227 = vmatmul.msk.bf16.gmra.mxu3 %vm174_vm3, %v217_v52  ;;  %1228 = vmatmul.msk.bf16.vlgmr.msrb.gmra.mxu0 %vm174_vm3, %v262_v62 }
 0x1d3   :  { %v311_v1 = vpop.permute.xlu0 %310 }
 0x1d5   :  { %1231 = vmatmul.msk.bf16.gmra.mxu1 %vm174_vm3, %v311_v1 }
 0x1dc   :  { %1229 = vmatmul.msk.bf16.gmra.mxu0 %vm174_vm3, %v264_v0 }
 0x227   :  { %v196_v2 = vpop.f32.mrf.mxu2 }
 0x228   :  { %v206_v28 = vmul.f32 0.35355338, %v196_v2 }
 0x22a   :  { %v1577_v32 = vadd.f32 %v206_v28, %v1568_v13 }
 0x22c   :  { %v355_v38 = vsel %vm130_vm2, %v1577_v32, -inf }
 0x22f   :  { %v198_v3 = vpop.f32.mrf.mxu2 }
 0x230   :  { %v207_v5 = vmul.f32 0.35355338, %v198_v3 }
 0x232   :  { %v1561_v6 = vadd.f32 %v207_v5, %v1558_v4 }
 0x237   :  { %v201_v7 = vpop.f32.mrf.mxu2 }
 0x238   :  { %v208_v9 = vmul.f32 0.35355338, %v201_v7 }
 0x23a   :  { %v1566_v10 = vadd.f32 %v208_v9, %v1563_v8 }
 0x23f   :  { %v243_v11 = vpop.f32.mrf.mxu3  ;;  %v203_v33 = vpop.f32.mrf.mxu2 }
 0x240   :  { %v253_v12 = vmul.f32 0.35355338, %v243_v11  ;;  %v209_v37 = vmul.f32 0.35355338, %v203_v33 }
 0x242   :  { %v257_v16 = vadd.f32 %v253_v12, %v1568_v13  ;;  %v1586_v40 = vadd.f32 %v209_v37, %v1579_v35  ;;  %v337_v7 = vpop.f32.mrf.mxu1  ;;  %v361_v37 = vsel %vm130_vm2, %v1566_v10, -inf }
 0x243   :  { %v347_v11 = vmul.f32 0.35355338, %v337_v7 }
 0x244   :  { %v367_v17 = vsel %vm130_vm2, %v257_v16, -inf  ;;  %v364_v41 = vsel %vm130_vm2, %v1586_v40, -inf }
 0x245   :  { %368 = vmax.xlane.f32.xlu1 %v367_v17  ;;  %v1619_v17 = vadd.f32 %v347_v11, %v1568_v13 }
 0x247   :  { %v245_v18 = vpop.f32.mrf.mxu3 }
 0x248   :  { %v254_v19 = vmul.f32 0.35355338, %v245_v18 }
 0x249   :  { %v290_v61 = vpop.f32.mrf.mxu0 }
 0x24a   :  { %v258_v20 = vadd.f32 %v254_v19, %v1558_v4  ;;  %v300_v63 = vmul.f32 0.35355338, %v290_v61  ;;  %v339_v18 = vpop.f32.mrf.mxu1 }
 0x24b   :  { %v348_v19 = vmul.f32 0.35355338, %v339_v18 }
 0x24c   :  { %v370_v23 = vsel %vm130_vm2, %v258_v20, -inf  ;;  %v1608_v1 = vadd.f32 %v300_v63, %v1568_v13 }
 0x24d   :  { %371 = vmax.xlane.f32.xlu2 %v370_v23  ;;  %v1624_v23 = vadd.f32 %v348_v19, %v1558_v4 }
 0x24e   :  { %v379_v5 = vsel %vm130_vm2, %v1608_v1, -inf }
 0x24f   :  { %v248_v25 = vpop.f32.mrf.mxu3 }
 0x250   :  { %v255_v26 = vmul.f32 0.35355338, %v248_v25 }
 0x251   :  { %v292_v2 = vpop.f32.mrf.mxu0 }
 0x252   :  { %v259_v27 = vadd.f32 %v255_v26, %v1563_v8  ;;  %v301_v3 = vmul.f32 0.35355338, %v292_v2 }
 0x254   :  { %v373_v29 = vsel %vm130_vm2, %v259_v27, -inf  ;;  %v1614_v9 = vadd.f32 %v301_v3, %v1558_v4  ;;  %v358_v4 = vsel %vm130_vm2, %v1561_v6, -inf }
 0x255   :  { %374 = vmax.xlane.f32.xlu0 %v373_v29 }
 0x256   :  { %v382_v12 = vsel %vm130_vm2, %v1614_v9, -inf }
 0x257   :  { %v250_v30 = vpop.f32.mrf.mxu3 }
 0x258   :  { %v256_v31 = vmul.f32 0.35355338, %v250_v30 }
 0x25a   :  { %v260_v36 = vadd.f32 %v256_v31, %v1579_v35 }
 0x25c   :  { %v376_v39 = vsel %vm130_vm2, %v260_v36, -inf }
 0x25d   :  { %356 = vmax.xlane.f32.xlu0 %v355_v38  ;;  %377 = vmax.xlane.f32.xlu2 %v376_v39  ;;  %v342_v39 = vpop.f32.mrf.mxu1 }
 0x265   :  { %365 = vmax.xlane.f32.xlu0 %v364_v41  ;;  %v349_v41 = vmul.f32 0.35355338, %v342_v39 }
 0x2b8   :  { %v369_v42 = vpop.xlane.xlu1 %368 }
 0x2b9   :  { %v407_v44 = vsub.f32 %v257_v16, %v369_v42  ;;  %v295_v16 = vpop.f32.mrf.mxu0 }
 0x2ba   :  { %v302_v31 = vmul.f32 0.35355338, %v295_v16 }
 0x2bb   :  { %v427_v45 = vmul.f32 1.442695, %v407_v44  ;;  %v1650_v44 = vadd.f32 %v349_v41, %v1563_v8  ;;  %v344_v41 = vpop.f32.mrf.mxu1 }
 0x2bd   :  { %1313 = vpow2.f32 %v427_v45  ;;  %v397_v45 = vsel %vm130_vm2, %v1650_v44, -inf }
 0x2c0   :  { %v372_v46 = vpop.xlane.xlu2 %371 }
 0x2c1   :  { %v408_v47 = vsub.f32 %v258_v20, %v372_v46  ;;  %v391_v20 = vsel %vm130_vm2, %v1619_v17, -inf  ;;  %v297_v25 = vpop.f32.mrf.mxu0 }
 0x2c2   :  { %v303_v26 = vmul.f32 0.35355338, %v297_v25 }
 0x2c3   :  { %v1590_v48 = vpop.eup %1313  ;;  %v429_v49 = vmul.f32 1.442695, %v408_v47 }
 0x2c4   :  { %v463_v50 = vsel %vm130_vm2, %v1590_v48, 0.0  ;;  %v1629_v28 = vadd.f32 %v303_v26, %v1579_v35 }
 0x2c5   :  { %1315 = vpow2.f32 %v429_v49  ;;  %464 = vadd.xlane.f32.xlu1 %v463_v50 }
 0x2c6   :  { %v388_v30 = vsel %vm130_vm2, %v1629_v28, -inf }
 0x2c8   :  { %v375_v51 = vpop.xlane.xlu0 %374 }
 0x2c9   :  { %v409_v52 = vsub.f32 %v259_v27, %v375_v51  ;;  %v394_v27 = vsel %vm130_vm2, %v1624_v23, -inf }
 0x2cb   :  { %v1594_v53 = vpop.eup %1315  ;;  %v431_v54 = vmul.f32 1.442695, %v409_v52 }
 0x2cc   :  { %v466_v55 = vsel %vm130_vm2, %v1594_v53, 0.0 }
 0x2cd   :  { %1317 = vpow2.f32 %v431_v54  ;;  %467 = vadd.xlane.f32.xlu2 %v466_v55 }
 0x2d0   :  { %v378_v56 = vpop.xlane.xlu2 %377  ;;  %v357_v13 = vpop.xlane.xlu0 %356 }
 0x2d1   :  { %v410_v57 = vsub.f32 %v260_v36, %v378_v56  ;;  %v403_v29 = vsub.f32 %v1577_v32, %v357_v13  ;;  %v1637_v36 = vadd.f32 %v302_v31, %v1563_v8 }
 0x2d3   :  { %v1598_v58 = vpop.eup %1317  ;;  %v433_v59 = vmul.f32 1.442695, %v410_v57  ;;  %v419_v33 = vmul.f32 1.442695, %v403_v29  ;;  %v385_v32 = vsel %vm130_vm2, %v1637_v36, -inf }
 0x2d4   :  { %v469_v60 = vsel %vm130_vm2, %v1598_v58, 0.0 }
 0x2d5   :  { %1319 = vpow2.f32 %v433_v59  ;;  %470 = vadd.xlane.f32.xlu0 %v469_v60 }
 0x2d6   :  { %1321 = vpow2.f32 %v419_v33 }
 0x2d8   :  { %v1658_v46 = vpop.xlane.xlu0 %365 }
 0x2db   :  { %v1602_v62 = vpop.eup %1319 }
 0x2dc   :  { %v472_v0 = vsel %vm130_vm2, %v1602_v62, 0.0  ;;  %v1643_v38 = vpop.eup %1321 }
 0x2dd   :  { %473 = vadd.xlane.f32.xlu0 %v472_v0  ;;  %v451_v42 = vsel %vm130_vm2, %v1643_v38, 0.0 }
 0x2de   :  { %603 = vrot.lane.b32.xlu1 %v1525_v43, %s1461_s11 }
 0x2e5   :  { %601 = vrot.lane.b32.xlu2 %v1522_v34, %s1461_s11  ;;  %380 = vmax.xlane.f32.xlu0 %v379_v5 }
 0x2ed   :  { %383 = vmax.xlane.f32.xlu0 %v382_v12 }
 0x2f5   :  { %392 = vmax.xlane.f32.xlu0 %v391_v20 }
 0x2fd   :  { %395 = vmax.xlane.f32.xlu0 %v394_v27 }
 0x305   :  { %389 = vmax.xlane.f32.xlu0 %v388_v30 }
 0x308   :  { %359 = vmax.xlane.f32.xlu1 %v358_v4 }
 0x30e   :  { %362 = vmax.xlane.f32.xlu2 %v361_v37 }
 0x310   :  { %386 = vmax.xlane.f32.xlu1 %v385_v32 }
 0x316   :  { %452 = vadd.xlane.f32.xlu2 %v451_v42 }
 0x319   :  { %559 = vrot.lane.b32.xlu0 %v1525_v43, %s1449_s20 }
 0x31e   :  { %398 = vmax.xlane.f32.xlu2 %v397_v45 }
 0x336   :  { %557 = vrot.lane.b32.xlu2 %v1522_v34, %s1449_s20 }
 0x338   :  { %v465_v47 = vpop.xlane.xlu1 %464 }
 0x33e   :  { %704 = vrot.lane.b32.xlu2 %v1525_v43, %s1462_s12 }
 0x340   :  { %v468_v49 = vpop.xlane.xlu2 %467 }
 0x341   :  { %1323 = vrcp.f32 %v468_v49 }
 0x342   :  { %1325 = vrcp.f32 %v465_v47 }
 0x347   :  { %v1324_v50 = vpop.eup %1323 }
 0x348   :  { %v471_v8 = vpop.xlane.xlu0 %470  ;;  %v1326_v51 = vpop.eup %1325  ;;  %v520_v52 = vmul.f32 %v1324_v50, %v1594_v53  ;;  %v350_v50 = vmul.f32 0.35355338, %v344_v41 }
 0x349   :  { %v519_v54 = vmul.f32 %v1326_v51, %v1590_v48  ;;  %v602_v63 = vpop.permute.xlu2 %601 }
 0x34a   :  { %v536_v55 = vpack.c.bf16 %v520_v52, %v520_v52 }
 0x34b   :  { %v535_v56 = vpack.c.bf16 %v519_v54, %v519_v54 }
 0x34c   :  { %v596_v60 = vunpack.c.l.b16 %v536_v55  ;;  %v1687_v55 = vadd.f32 %v350_v50, %v1579_v35 }
 0x34d   :  { %v595_v61 = vunpack.c.l.b16 %v535_v56 }
 0x34f   :  { %v599_v0 = vpack.c.b16 %v596_v60, %v595_v61  ;;  %v406_v61 = vsub.f32 %v1586_v40, %v1658_v46 }
 0x350   :  { %v604_v57 = vpop.permute.xlu1 %603  ;;  %v474_v59 = vpop.xlane.xlu0 %473 }
 0x351   :  { %1327 = vrcp.f32 %v474_v59  ;;  %619 = vmatpush.bf16.msrb.mxu3 %v604_v57 }
 0x352   :  { %1329 = vrcp.f32 %v471_v8 }
 0x355   :  { %620 = vmatpush.bf16.msrb.mxu3 %v602_v63 }
 0x357   :  { %v1328_v2 = vpop.eup %1327 }
 0x358   :  { %1234 = vmatmul.msk.bf16.vlgmr.msrb.gmra.mxu3 %vm130_vm2, %v599_v0  ;;  %v381_v3 = vpop.xlane.xlu0 %380  ;;  %v1330_v5 = vpop.eup %1329  ;;  %v522_v48 = vmul.f32 %v1328_v2, %v1602_v62  ;;  %v425_v2 = vmul.f32 1.442695, %v406_v61 }
 0x359   :  { %v411_v53 = vsub.f32 %v1608_v1, %v381_v3  ;;  %v521_v11 = vmul.f32 %v1330_v5, %v1598_v58 }
 0x35a   :  { %v538_v12 = vpack.c.bf16 %v522_v48, %v522_v48  ;;  %v632_v48 = vld [vmem:[#allocation2 + $0x20] sm:$0xf] }
 0x35b   :  { %v435_v7 = vmul.f32 1.442695, %v411_v53  ;;  %v537_v18 = vpack.c.bf16 %v521_v11, %v521_v11 }
 0x35c   :  { %v598_v19 = vunpack.c.l.b16 %v538_v12 }
 0x35d   :  { %1331 = vpow2.f32 %v435_v7  ;;  %v597_v26 = vunpack.c.l.b16 %v537_v18  ;;  %v643_v7 = vsel %vm641_vm4, %v632_v48, 0 }
 0x35e   :  { %652 = vmatpush.bf16.msra.mxu0 %v643_v7 }
 0x35f   :  { %v600_v27 = vpack.c.b16 %v598_v19, %v597_v26 }
 0x360   :  { %v384_v16 = vpop.xlane.xlu0 %383 }
 0x363   :  { %v1666_v20 = vpop.eup %1331 }
 0x364   :  { %v475_v25 = vsel %vm130_vm2, %v1666_v20, 0.0 }
 0x365   :  { %476 = vadd.xlane.f32.xlu0 %v475_v25 }
 0x368   :  { %1235 = vmatmul.msk.bf16.gmra.mxu3 %vm130_vm2, %v600_v27  ;;  %v393_v1 = vpop.xlane.xlu0 %392 }
 0x369   :  { %v415_v62 = vsub.f32 %v1619_v17, %v393_v1 }
 0x36b   :  { %v443_v13 = vmul.f32 1.442695, %v415_v62 }
 0x36d   :  { %1333 = vpow2.f32 %v443_v13 }
 0x370   :  { %v1676_v30 = vpop.xlane.xlu0 %395 }
 0x373   :  { %v1672_v58 = vpop.eup %1333 }
 0x374   :  { %v487_v29 = vsel %vm130_vm2, %v1672_v58, 0.0 }
 0x375   :  { %488 = vadd.xlane.f32.xlu2 %v487_v29 }
 0x378   :  { %v390_v32 = vpop.xlane.xlu0 %389 }
 0x379   :  { %v414_v42 = vsub.f32 %v1629_v28, %v390_v32  ;;  %v412_v28 = vsub.f32 %v1614_v9, %v384_v16 }
 0x37b   :  { %v360_v31 = vpop.xlane.xlu1 %359  ;;  %v437_v57 = vmul.f32 1.442695, %v412_v28 }
 0x37c   :  { %v404_v4 = vsub.f32 %v1561_v6, %v360_v31  ;;  %v441_v6 = vmul.f32 1.442695, %v414_v42 }
 0x37e   :  { %v421_v33 = vmul.f32 1.442695, %v404_v4 }
 0x380   :  { %1335 = vpow2.f32 %v421_v33 }
 0x381   :  { %v363_v37 = vpop.xlane.xlu2 %362 }
 0x382   :  { %v405_v47 = vsub.f32 %v1566_v10, %v363_v37 }
 0x383   :  { %v387_v39 = vpop.xlane.xlu1 %386 }
 0x384   :  { %v413_v17 = vsub.f32 %v1637_v36, %v387_v39  ;;  %v423_v52 = vmul.f32 1.442695, %v405_v47  ;;  %v400_v36 = vsel %vm130_vm2, %v1687_v55, -inf }
 0x386   :  { %v1681_v45 = vpop.eup %1335  ;;  %v439_v49 = vmul.f32 1.442695, %v413_v17 }
 0x387   :  { %v454_v8 = vsel %vm130_vm2, %v1681_v45, 0.0 }
 0x388   :  { %1337 = vpow2.f32 %v439_v49  ;;  %455 = vadd.xlane.f32.xlu1 %v454_v8 }
 0x389   :  { %v453_v51 = vpop.xlane.xlu2 %452  ;;  %1339 = vpow2.f32 %v441_v6 }
 0x38a   :  { %1341 = vpow2.f32 %v423_v52 }
 0x38b   :  { %v560_v54 = vpop.permute.xlu0 %559  ;;  %1343 = vpow2.f32 %v437_v57 }
 0x38c   :  { %575 = vmatpush.bf16.msrb.mxu2 %v560_v54  ;;  %1345 = vpow2.f32 %v425_v2 }
 0x38d   :  { %778 = vrot.lane.b32.xlu2 %v1522_v34, %s1463_s13 }
 0x38e   :  { %v1691_v10 = vpop.eup %1337 }
 0x38f   :  { %v481_v56 = vsel %vm130_vm2, %v1691_v10, 0.0  ;;  %v1698_v59 = vpop.eup %1339 }
 0x390   :  { %401 = vmax.xlane.f32.xlu1 %v400_v36  ;;  %482 = vadd.xlane.f32.xlu0 %v481_v56  ;;  %v1700_v60 = vpop.eup %1341  ;;  %v484_v63 = vsel %vm130_vm2, %v1698_v59, 0.0 }
 0x391   :  { %v399_v35 = vpop.xlane.xlu2 %398  ;;  %v457_v9 = vsel %vm130_vm2, %v1700_v60, 0.0  ;;  %v1708_v3 = vpop.eup %1343 }
 0x392   :  { %v478_v5 = vsel %vm130_vm2, %v1708_v3, 0.0  ;;  %v1712_v46 = vpop.eup %1345  ;;  %v417_v11 = vsub.f32 %v1650_v44, %v399_v35 }
 0x393   :  { %v460_v53 = vsel %vm130_vm2, %v1712_v46, 0.0 }
 0x394   :  { %v447_v12 = vmul.f32 1.442695, %v417_v11 }
 0x396   :  { %1347 = vpow2.f32 %v447_v12 }
 0x398   :  { %458 = vadd.xlane.f32.xlu1 %v457_v9  ;;  %485 = vadd.xlane.f32.xlu0 %v484_v63 }
 0x399   :  { %v558_v0 = vpop.permute.xlu2 %557 }
 0x39a   :  { %576 = vmatpush.bf16.msrb.mxu2 %v558_v0 }
 0x39c   :  { %v1722_v16 = vpop.eup %1347 }
 0x39d   :  { %v493_v18 = vsel %vm130_vm2, %v1722_v16, 0.0 }
 0x3a0   :  { %479 = vadd.xlane.f32.xlu1 %v478_v5 }
 0x3a1   :  { %v705_v40 = vpop.permute.xlu2 %704 }
 0x3a2   :  { %720 = vmatpush.bf16.msra.mxu2 %v705_v40 }
 0x3a8   :  { %461 = vadd.xlane.f32.xlu1 %v460_v53 }
 0x3ac   :  { %780 = vrot.lane.b32.xlu0 %v1525_v43, %s1463_s13  ;;  %v416_v43 = vsub.f32 %v1624_v23, %v1676_v30 }
 0x3c1   :  { %702 = vrot.lane.b32.xlu1 %v1522_v34, %s1462_s12  ;;  %v445_v34 = vmul.f32 1.442695, %v416_v43 }
 0x3c3   :  { %1349 = vpow2.f32 %v445_v34 }
 0x3c4   :  { %1351 = vrcp.f32 %v453_v51 }
 0x3c9   :  { %v1729_v44 = vpop.eup %1349 }
 0x3ca   :  { %v490_v27 = vsel %vm130_vm2, %v1729_v44, 0.0  ;;  %v1352_v29 = vpop.eup %1351 }
 0x3cb   :  { %v515_v30 = vmul.f32 %v1352_v29, %v1643_v38 }
 0x3cd   :  { %v531_v4 = vpack.c.bf16 %v515_v30, %v515_v30 }
 0x3cf   :  { %v551_v42 = vunpack.c.l.b16 %v531_v4 }
 0x3d6   :  { %494 = vadd.xlane.f32.xlu0 %v493_v18 }
 0x3d8   :  { %v477_v32 = vpop.xlane.xlu0 %476 }
 0x3db   :  { %v622_v19 = vpop.f32.mrf.mxu3 }
 0x3e3   :  { %v624_v25 = vpop.f32.mrf.mxu3 }
 0x3e4   :  { %v633_v26 = vpack.c.bf16 %v624_v25, %v622_v19 }
 0x3e6   :  { %1236 = vmatmul.msk.bf16.vlgmr.msra.gmra.mxu0 %vm174_vm3, %v633_v26 }
 0x3e8   :  { %v489_v52 = vpop.xlane.xlu2 %488 }
 0x3eb   :  { %v627_v1 = vpop.f32.mrf.mxu3  ;;  %491 = vadd.xlane.f32.xlu1 %v490_v27 }
 0x3f0   :  { %v779_v35 = vpop.permute.xlu2 %778 }
 0x3f3   :  { %v629_v62 = vpop.f32.mrf.mxu3 }
 0x3f4   :  { %v634_v13 = vpack.c.bf16 %v629_v62, %v627_v1 }
 0x3f6   :  { %1237 = vmatmul.msk.bf16.gmra.mxu0 %vm174_vm3, %v634_v13 }
 0x3fb   :  { %v456_v23 = vpop.xlane.xlu1 %455 }
 0x3fc   :  { %1353 = vrcp.f32 %v456_v23 }
 0x402   :  { %v1354_v31 = vpop.eup %1353 }
 0x403   :  { %v516_v33 = vmul.f32 %v1354_v31, %v1681_v45  ;;  %v402_v37 = vpop.xlane.xlu1 %401  ;;  %v483_v8 = vpop.xlane.xlu0 %482 }
 0x404   :  { %v418_v39 = vsub.f32 %v1687_v55, %v402_v37  ;;  %v588_v37 = vld [vmem:[#allocation2 + $0x18] sm:$0xf] }
 0x405   :  { %v532_v41 = vpack.c.bf16 %v516_v33, %v516_v33 }
 0x406   :  { %v449_v17 = vmul.f32 1.442695, %v418_v39 }
 0x407   :  { %v552_v47 = vunpack.c.l.b16 %v532_v41 }
 0x408   :  { %1355 = vpow2.f32 %v449_v17 }
 0x409   :  { %v555_v49 = vpack.c.b16 %v552_v47, %v551_v42 }
 0x40b   :  { %v459_v50 = vpop.xlane.xlu1 %458  ;;  %1232 = vmatmul.msk.bf16.vlgmr.msrb.gmra.mxu2 %vm130_vm2, %v555_v49  ;;  %v486_v51 = vpop.xlane.xlu0 %485 }
 0x40c   :  { %1357 = vrcp.f32 %v459_v50 }
 0x40e   :  { %v1738_v6 = vpop.eup %1355 }
 0x40f   :  { %v496_v38 = vsel %vm130_vm2, %v1738_v6, 0.0 }
 0x410   :  { %497 = vadd.xlane.f32.xlu1 %v496_v38 }
 0x412   :  { %v1358_v55 = vpop.eup %1357 }
 0x413   :  { %v480_v45 = vpop.xlane.xlu1 %479  ;;  %v517_v36 = vmul.f32 %v1358_v55, %v1700_v60 }
 0x415   :  { %v533_v61 = vpack.c.bf16 %v517_v36, %v517_v36 }
 0x417   :  { %v553_v63 = vunpack.c.l.b16 %v533_v61 }
 0x41b   :  { %v462_v54 = vpop.xlane.xlu1 %461 }
 0x41c   :  { %1359 = vrcp.f32 %v462_v54  ;;  %v733_v54 = vld [vmem:[#allocation2 + $0x28] sm:$0xf] }
 0x41d   :  { %1361 = vrcp.f32 %v480_v45  ;;  %v743_v55 = vsel %vm641_vm4, %v733_v54, 0 }
 0x41e   :  { %v781_v28 = vpop.permute.xlu0 %780  ;;  %1363 = vrcp.f32 %v477_v32  ;;  %v671_v32 = vsel %vm641_vm4, %v588_v37, 0  ;;  %752 = vmatpush.bf16.msra.mxu3 %v743_v55 }
 0x41f   :  { %796 = vmatpush.bf16.msrb.mxu0 %v781_v28  ;;  %1365 = vrcp.f32 %v486_v51  ;;  %680 = vmatpush.bf16.msra.mxu1 %v671_v32 }
 0x420   :  { %1367 = vrcp.f32 %v483_v8 }
 0x421   :  { %1369 = vrcp.f32 %v489_v52 }
 0x422   :  { %v1360_v56 = vpop.eup %1359 }
 0x423   :  { %797 = vmatpush.bf16.msrb.mxu0 %v779_v35  ;;  %v518_v57 = vmul.f32 %v1360_v56, %v1712_v46  ;;  %v1362_v5 = vpop.eup %1361 }
 0x424   :  { %v1364_v40 = vpop.eup %1363  ;;  %v524_v53 = vmul.f32 %v1362_v5, %v1708_v3 }
 0x425   :  { %v534_v9 = vpack.c.bf16 %v518_v57, %v518_v57  ;;  %v523_v60 = vmul.f32 %v1364_v40, %v1666_v20  ;;  %v1366_v43 = vpop.eup %1365 }
 0x426   :  { %v540_v48 = vpack.c.bf16 %v524_v53, %v524_v53  ;;  %v1368_v19 = vpop.eup %1367  ;;  %v526_v34 = vmul.f32 %v1366_v43, %v1698_v59 }
 0x427   :  { %v554_v0 = vunpack.c.l.b16 %v534_v9  ;;  %v539_v7 = vpack.c.bf16 %v523_v60, %v523_v60  ;;  %v525_v25 = vmul.f32 %v1368_v19, %v1691_v10  ;;  %v1370_v13 = vpop.eup %1369 }
 0x428   :  { %v697_v46 = vunpack.c.l.b16 %v540_v48  ;;  %v542_v3 = vpack.c.bf16 %v526_v34, %v526_v34  ;;  %v527_v23 = vmul.f32 %v1370_v13, %v1672_v58 }
 0x429   :  { %v556_v2 = vpack.c.b16 %v554_v0, %v553_v63  ;;  %v696_v12 = vunpack.c.l.b16 %v539_v7  ;;  %v541_v26 = vpack.c.bf16 %v525_v25, %v525_v25  ;;  %v809_v63 = vld [vmem:[#allocation2 + $0x30] sm:$0xf] }
 0x42a   :  { %v699_v20 = vunpack.c.l.b16 %v542_v3  ;;  %v543_v30 = vpack.c.bf16 %v527_v23, %v527_v23  ;;  %v819_v0 = vsel %vm641_vm4, %v809_v63, 0 }
 0x42b   :  { %1233 = vmatmul.msk.bf16.gmra.mxu2 %vm130_vm2, %v556_v2  ;;  %v700_v18 = vpack.c.b16 %v697_v46, %v696_v12  ;;  %v698_v27 = vunpack.c.l.b16 %v541_v26  ;;  %828 = vmatpush.bf16.msrb.mxu1 %v819_v0 }
 0x42c   :  { %v772_v4 = vunpack.c.l.b16 %v543_v30 }
 0x42d   :  { %v701_v1 = vpack.c.b16 %v699_v20, %v698_v27  ;;  %v844_v20 = vperm.slane %v1519_v24, 1 }
 0x433   :  { %v703_v11 = vpop.permute.xlu1 %702 }
 0x434   :  { %721 = vmatpush.bf16.msra.mxu2 %v703_v11 }
 0x43b   :  { %1240 = vmatmul.msk.bf16.vlgmr.msra.gmra.mxu2 %vm130_vm2, %v700_v18 }
 0x449   :  { %v495_v39 = vpop.xlane.xlu0 %494 }
 0x44b   :  { %1241 = vmatmul.msk.bf16.gmra.mxu2 %vm130_vm2, %v701_v1 }
 0x45e   :  { %v492_v62 = vpop.xlane.xlu1 %491 }
 0x45f   :  { %1371 = vrcp.f32 %v492_v62 }
 0x460   :  { %1373 = vrcp.f32 %v495_v39 }
 0x463   :  { %v654_v56 = vpop.f32.mrf.mxu0 }
 0x465   :  { %v1372_v29 = vpop.eup %1371 }
 0x466   :  { %v528_v31 = vmul.f32 %v1372_v29, %v1729_v44  ;;  %v1374_v17 = vpop.eup %1373 }
 0x467   :  { %v529_v58 = vmul.f32 %v1374_v17, %v1722_v16 }
 0x468   :  { %v544_v59 = vpack.c.bf16 %v528_v31, %v528_v31 }
 0x469   :  { %v545_v47 = vpack.c.bf16 %v529_v58, %v529_v58 }
 0x46a   :  { %v773_v10 = vunpack.c.l.b16 %v544_v59 }
 0x46b   :  { %v774_v8 = vunpack.c.l.b16 %v545_v47  ;;  %v656_v9 = vpop.f32.mrf.mxu0 }
 0x46c   :  { %v776_v33 = vpack.c.b16 %v773_v10, %v772_v4 }
 0x46e   :  { %1244 = vmatmul.msk.bf16.vlgmr.msrb.gmra.mxu0 %vm130_vm2, %v776_v33 }
 0x473   :  { %v659_v40 = vpop.f32.mrf.mxu0 }
 0x47b   :  { %v661_v53 = vpop.f32.mrf.mxu0 }
 0x483   :  { %v498_v41 = vpop.xlane.xlu1 %497 }
 0x484   :  { %1375 = vrcp.f32 %v498_v41 }
 0x48a   :  { %v1376_v42 = vpop.eup %1375 }
 0x48b   :  { %v530_v44 = vmul.f32 %v1376_v42, %v1738_v6 }
 0x48d   :  { %v546_v49 = vpack.c.bf16 %v530_v44, %v530_v44 }
 0x48e   :  { %v578_v50 = vpop.f32.mrf.mxu2 }
 0x48f   :  { %v775_v38 = vunpack.c.l.b16 %v546_v49 }
 0x491   :  { %v777_v45 = vpack.c.b16 %v775_v38, %v774_v8 }
 0x493   :  { %1245 = vmatmul.msk.bf16.gmra.mxu0 %vm130_vm2, %v777_v45 }
 0x496   :  { %v580_v51 = vpop.f32.mrf.mxu2 }
 0x497   :  { %v589_v52 = vpack.c.bf16 %v580_v51, %v578_v50  ;;  %v1464_v51 = vmov 32.0  }
 0x498   :  { %1377 = vrcp.f32 %v1464_v51 }
 0x499   :  { %1238 = vmatmul.msk.bf16.vlgmr.msra.gmra.mxu1 %vm174_vm3, %v589_v52 }
 0x49e   :  { %v1378_v52 = vpop.eup %1377 }
 0x49f   :  { %v866_v54 = vmul.f32 32.0, %v1378_v52  ;;  %vm870_vm5 = vweird.f32 %v1378_v52 }
 0x4a1   :  { %v867_v55 = vsub.f32 1.0, %v866_v54 }
 0x4ae   :  { %v583_v16 = vpop.f32.mrf.mxu2 }
 0x4b6   :  { %v585_v28 = vpop.f32.mrf.mxu2 }
 0x4b7   :  { %v590_v36 = vpack.c.bf16 %v585_v28, %v583_v16  ;;  %v868_v16 = vmul.f32 %v1378_v52, %v867_v55 }
 0x4b9   :  { %1239 = vmatmul.msk.bf16.gmra.mxu1 %vm174_vm3, %v590_v36  ;;  %v869_v28 = vadd.f32 %v1378_v52, %v868_v16 }
 0x4be   :  { %v723_v6 = vpop.f32.mrf.mxu2 }
 0x4c6   :  { %v725_v35 = vpop.f32.mrf.mxu2 }
 0x4c7   :  { %v734_v57 = vpack.c.bf16 %v725_v35, %v723_v6 }
 0x4c9   :  { %1242 = vmatmul.msk.bf16.vlgmr.msra.gmra.mxu3 %vm174_vm3, %v734_v57 }
 0x4ce   :  { %v728_v61 = vpop.f32.mrf.mxu2 }
 0x4d6   :  { %v730_v2 = vpop.f32.mrf.mxu2 }
 0x4d7   :  { %v735_v5 = vpack.c.bf16 %v730_v2, %v728_v61 }
 0x4d9   :  { %1243 = vmatmul.msk.bf16.gmra.mxu3 %vm174_vm3, %v735_v5 }
 0x4eb   :  { %v799_v60 = vpop.f32.mrf.mxu0 }
 0x4f3   :  { %v801_v48 = vpop.f32.mrf.mxu0 }
 0x4f4   :  { %v810_v7 = vpack.c.bf16 %v801_v48, %v799_v60 }
 0x4f6   :  { %1246 = vmatmul.msk.bf16.vlgmr.msrb.gmra.mxu1 %vm174_vm3, %v810_v7 }
 0x510   :  { %v804_v11 = vpop.f32.mrf.mxu0 }
 0x516   :  { %v682_v18 = vpop.f32.mrf.mxu1 }
 0x517   :  { %v683_v3 = vadd.f32 %v682_v18, %v654_v56  ;;  %v1289_v18 = vld [vmem:[#allocation2 + $0x40] sm:$0xff] }
 0x518   :  { %v806_v46 = vpop.f32.mrf.mxu0  ;;  %985 = vmatpush.bf16.msrb.mxu2 %v1289_v18  ;;  %v1291_v18 = vld [vmem:[#allocation2 + $0x50] sm:$0xff] }
 0x519   :  { %v811_v12 = vpack.c.bf16 %v806_v46, %v804_v11 }
 0x51b   :  { %1247 = vmatmul.msk.bf16.gmra.mxu1 %vm174_vm3, %v811_v12  ;;  %vm1029_vm3 = vcmask 523264  }
 0x51e   :  { %v684_v43 = vpop.f32.mrf.mxu1 }
 0x51f   :  { %v685_v23 = vadd.f32 %v684_v43, %v656_v9 }
 0x536   :  { %v687_v19 = vpop.f32.mrf.mxu1 }
 0x537   :  { %v688_v32 = vadd.f32 %v687_v19, %v659_v40 }
 0x53e   :  { %v689_v34 = vpop.f32.mrf.mxu1 }
 0x54c   :  { %v754_v25 = vpop.f32.mrf.mxu3 }
 0x54d   :  { %v764_v26 = vadd.f32 %v754_v25, %v683_v3  ;;  %v1288_v25 = vld [vmem:[#allocation2 + $0x38] sm:$0xff] }
 0x54e   :  { %986 = vmatpush.bf16.msrb.mxu2 %v1288_v25 }
 0x554   :  { %v756_v13 = vpop.f32.mrf.mxu3 }
 0x555   :  { %v765_v30 = vadd.f32 %v756_v13, %v685_v23 }
 0x55c   :  { %v759_v24 = vpop.f32.mrf.mxu3 }
 0x55d   :  { %v766_v39 = vadd.f32 %v759_v24, %v688_v32 }
 0x564   :  { %v761_v42 = vpop.f32.mrf.mxu3 }
 0x573   :  { %v830_v27 = vpop.f32.mrf.mxu1 }
 0x574   :  { %v840_v1 = vadd.f32 %v830_v27, %v764_v26 }
 0x576   :  { %v845_v62 = vadd.f32 %v844_v20, %v840_v1 }
 0x578   :  { %v849_v29 = vadd.f32 %v845_v62, %v1505_v14  ;;  %v690_v14 = vadd.f32 %v689_v34, %v661_v53 }
 0x57a   :  { %v853_v31 = vsel %vm130_vm2, %v849_v29, 0.0  ;;  %v767_v47 = vadd.f32 %v761_v42, %v690_v14 }
 0x57b   :  { %854 = vadd.xlane.f32.xlu2 %v853_v31  ;;  %v832_v59 = vpop.f32.mrf.mxu1 }
 0x57c   :  { %v841_v4 = vadd.f32 %v832_v59, %v765_v30 }
 0x57e   :  { %v846_v10 = vadd.f32 %v844_v20, %v841_v4 }
 0x580   :  { %v850_v33 = vadd.f32 %v846_v10, %v1507_v15 }
 0x582   :  { %v856_v37 = vsel %vm130_vm2, %v850_v33, 0.0 }
 0x583   :  { %857 = vadd.xlane.f32.xlu1 %v856_v37  ;;  %v1795_v37 = vld [vmem:[#allocation4] sm:$0xff] }
 0x584   :  { %v948_v24 = vperm.slane %v1795_v37, 2 }
 0x598   :  { %v835_v41 = vpop.f32.mrf.mxu1 }
 0x599   :  { %v842_v17 = vadd.f32 %v835_v41, %v766_v39 }
 0x59b   :  { %v847_v58 = vadd.f32 %v844_v20, %v842_v17  ;;  %v953_v17 = vperm.slane %v1795_v37, 3 }
 0x59d   :  { %v851_v44 = vadd.f32 %v847_v58, %v1512_v21  ;;  %v1775_v21 = vsel %vm870_vm5, %v1378_v52, %v869_v28 }
 0x59f   :  { %v859_v49 = vsel %vm130_vm2, %v851_v44, 0.0 }
 0x5a0   :  { %860 = vadd.xlane.f32.xlu1 %v859_v49  ;;  %v837_v50 = vpop.f32.mrf.mxu1 }
 0x5a1   :  { %v843_v8 = vadd.f32 %v837_v50, %v767_v47 }
 0x5a3   :  { %v848_v15 = vadd.f32 %v844_v20, %v843_v8 }
 0x5a5   :  { %v852_v38 = vadd.f32 %v848_v15, %v1514_v22 }
 0x5a7   :  { %v862_v45 = vsel %vm130_vm2, %v852_v38, 0.0 }
 0x5a8   :  { %863 = vadd.xlane.f32.xlu1 %v862_v45 }
 0x5ee   :  { %v855_v36 = vpop.xlane.xlu2 %854 }
 0x5ef   :  { %v872_v6 = vmul.f32 %v1775_v21, %v855_v36 }
 0x5f1   :  { %v876_v56 = vsub.f32 %v849_v29, %v872_v6 }
 0x5f3   :  { %v880_v35 = vmul.f32 %v876_v56, %v876_v56 }
 0x5f5   :  { %v884_v22 = vsel %vm130_vm2, %v880_v35, 0.0 }
 0x5f6   :  { %v858_v57 = vpop.xlane.xlu1 %857  ;;  %885 = vadd.xlane.f32.xlu1 %v884_v22 }
 0x5f7   :  { %v873_v61 = vmul.f32 %v1775_v21, %v858_v57 }
 0x5f9   :  { %v877_v9 = vsub.f32 %v850_v33, %v873_v61 }
 0x5fb   :  { %v881_v63 = vmul.f32 %v877_v9, %v877_v9 }
 0x5fd   :  { %v887_v0 = vsel %vm130_vm2, %v881_v63, 0.0 }
 0x5fe   :  { %888 = vadd.xlane.f32.xlu0 %v887_v0 }
 0x613   :  { %v861_v2 = vpop.xlane.xlu1 %860 }
 0x614   :  { %v874_v5 = vmul.f32 %v1775_v21, %v861_v2 }
 0x616   :  { %v1782_v40 = vsub.f32 %v851_v44, %v874_v5 }
 0x618   :  { %v882_v53 = vmul.f32 %v1782_v40, %v1782_v40 }
 0x61a   :  { %v890_v60 = vsel %vm130_vm2, %v882_v53, 0.0 }
 0x61b   :  { %891 = vadd.xlane.f32.xlu1 %v890_v60  ;;  %v864_v48 = vpop.xlane.xlu1 %863 }
 0x61c   :  { %v875_v7 = vmul.f32 %v1775_v21, %v864_v48 }
 0x61e   :  { %v1788_v11 = vsub.f32 %v852_v38, %v875_v7 }
 0x620   :  { %v883_v46 = vmul.f32 %v1788_v11, %v1788_v11 }
 0x622   :  { %v893_v12 = vsel %vm130_vm2, %v883_v46, 0.0  ;;  %v1293_v46 = vld [vmem:[#allocation2 + $0x60] sm:$0xff] }
 0x623   :  { %894 = vadd.xlane.f32.xlu2 %v893_v12  ;;  %1040 = vmatpush.bf16.msrb.mxu3 %v1293_v46  ;;  %v1292_v12 = vld [vmem:[#allocation2 + $0x58] sm:$0xff] }
 0x627   :  { %1041 = vmatpush.bf16.msrb.mxu3 %v1292_v12 }
 0x62b   :  { %1042 = vmatpush.bf16.msrb.mxu3 %v1291_v18 }
 0x669   :  { %v886_v43 = vpop.xlane.xlu1 %885 }
 0x66a   :  { %v896_v19 = vmul.f32 %v886_v43, %v1775_v21 }
 0x66c   :  { %v900_v34 = vadd.f32 1e-05, %v896_v19  ;;  %v960_v19 = vperm.slane %v1795_v37, 4 }
 0x66e   :  { %1379 = vrsqrt.f32 %v900_v34  ;;  %vm910_vm7 = vweird.f32 %v900_v34 }
 0x671   :  { %v889_v3 = vpop.xlane.xlu0 %888 }
 0x672   :  { %v897_v26 = vmul.f32 %v889_v3, %v1775_v21 }
 0x674   :  { %v1380_v20 = vpop.eup %1379  ;;  %v901_v27 = vadd.f32 1e-05, %v897_v26 }
 0x675   :  { %v905_v1 = vmul.f32 %v1380_v20, %v900_v34  ;;  %vm911_vm6 = vweird.f32 %v1380_v20 }
 0x676   :  { %1381 = vrsqrt.f32 %v901_v27  ;;  %vm912_vm8 = vmor %vm910_vm7, %vm911_vm6  ;;  %vm920_vm10 = vweird.f32 %v901_v27 }
 0x677   :  { %v906_v62 = vmul.f32 %v1380_v20, %v905_v1 }
 0x679   :  { %v907_v13 = vmul.f32 0.5, %v906_v62 }
 0x67b   :  { %v908_v23 = vsub.f32 1.5, %v907_v13 }
 0x67c   :  { %v1382_v29 = vpop.eup %1381 }
 0x67d   :  { %v909_v30 = vmul.f32 %v1380_v20, %v908_v23  ;;  %v915_v31 = vmul.f32 %v1382_v29, %v901_v27  ;;  %vm921_vm9 = vweird.f32 %v1382_v29 }
 0x67e   :  { %vm922_vm11 = vmor %vm920_vm10, %vm921_vm9 }
 0x67f   :  { %v916_v59 = vmul.f32 %v1382_v29, %v915_v31  ;;  %v913_v4 = vsel %vm912_vm8, %v1380_v20, %v909_v30  ;;  %v1004_v31 = vperm.slane %v1795_v37, 5 }
 0x680   :  { %v944_v32 = vmul.f32 %v913_v4, %v876_v56 }
 0x681   :  { %v917_v10 = vmul.f32 0.5, %v916_v59 }
 0x682   :  { %v949_v58 = vmul.f32 %v948_v24, %v944_v32 }
 0x683   :  { %v918_v33 = vsub.f32 1.5, %v917_v10 }
 0x684   :  { %v1799_v44 = vadd.f32 %v953_v17, %v949_v58 }
 0x685   :  { %v919_v39 = vmul.f32 %v1382_v29, %v918_v33 }
 0x687   :  { %v923_v41 = vsel %vm922_vm11, %v1382_v29, %v919_v39 }
 0x688   :  { %v945_v42 = vmul.f32 %v923_v41, %v877_v9 }
 0x68a   :  { %v950_v14 = vmul.f32 %v948_v24, %v945_v42 }
 0x68c   :  { %v1801_v47 = vadd.f32 %v953_v17, %v950_v14 }
 0x68e   :  { %v892_v49 = vpop.xlane.xlu1 %891  ;;  %v958_v50 = vpack.c.bf16 %v1801_v47, %v1799_v44 }
 0x68f   :  { %v898_v8 = vmul.f32 %v892_v49, %v1775_v21 }
 0x690   :  { %1256 = vmatmul.msk.bf16.vlgmr.msrb.gmra.mxu2 %vm130_vm2, %v958_v50 }
 0x691   :  { %v902_v15 = vadd.f32 1e-05, %v898_v8 }
 0x693   :  { %1383 = vrsqrt.f32 %v902_v15  ;;  %vm930_vm13 = vweird.f32 %v902_v15 }
 0x696   :  { %v895_v38 = vpop.xlane.xlu2 %894 }
 0x697   :  { %v899_v45 = vmul.f32 %v895_v38, %v1775_v21 }
 0x699   :  { %v1384_v51 = vpop.eup %1383  ;;  %v903_v52 = vadd.f32 1e-05, %v899_v45 }
 0x69a   :  { %v925_v54 = vmul.f32 %v1384_v51, %v902_v15  ;;  %vm931_vm12 = vweird.f32 %v1384_v51 }
 0x69b   :  { %1385 = vrsqrt.f32 %v903_v52  ;;  %vm932_vm14 = vmor %vm930_vm13, %vm931_vm12  ;;  %vm940_vm0 = vweird.f32 %v903_v52 }
 0x69c   :  { %v926_v55 = vmul.f32 %v1384_v51, %v925_v54 }
 0x69e   :  { %v927_v16 = vmul.f32 0.5, %v926_v55 }
 0x6a0   :  { %v928_v28 = vsub.f32 1.5, %v927_v16 }
 0x6a1   :  { %v1386_v36 = vpop.eup %1385 }
 0x6a2   :  { %v929_v6 = vmul.f32 %v1384_v51, %v928_v28  ;;  %v935_v56 = vmul.f32 %v1386_v36, %v903_v52  ;;  %vm941_vm15 = vweird.f32 %v1386_v36 }
 0x6a3   :  { %vm942_vm1 = vmor %vm940_vm0, %vm941_vm15 }
 0x6a4   :  { %v936_v35 = vmul.f32 %v1386_v36, %v935_v56  ;;  %v933_v22 = vsel %vm932_vm14, %v1384_v51, %v929_v6 }
 0x6a5   :  { %v946_v9 = vmul.f32 %v933_v22, %v1782_v40  ;;  %v1290_v40 = vld [vmem:[#allocation2 + $0x48] sm:$0xff] }
 0x6a6   :  { %v937_v57 = vmul.f32 0.5, %v936_v35  ;;  %1043 = vmatpush.bf16.msrb.mxu3 %v1290_v40 }
 0x6a7   :  { %v951_v5 = vmul.f32 %v948_v24, %v946_v9 }
 0x6a8   :  { %v938_v61 = vsub.f32 1.5, %v937_v57 }
 0x6a9   :  { %v956_v60 = vadd.f32 %v953_v17, %v951_v5 }
 0x6aa   :  { %v939_v63 = vmul.f32 %v1386_v36, %v938_v61 }
 0x6ac   :  { %v943_v0 = vsel %vm942_vm1, %v1386_v36, %v939_v63 }
 0x6ad   :  { %v947_v2 = vmul.f32 %v943_v0, %v1788_v11 }
 0x6af   :  { %v952_v53 = vmul.f32 %v948_v24, %v947_v2 }
 0x6b1   :  { %v957_v48 = vadd.f32 %v953_v17, %v952_v53 }
 0x6b3   :  { %v959_v7 = vpack.c.bf16 %v957_v48, %v956_v60 }
 0x6b5   :  { %1257 = vmatmul.msk.bf16.gmra.mxu2 %vm130_vm2, %v959_v7 }
 0x713   :  { %v988_v43 = vpop.f32.mrf.mxu2 }
 0x714   :  { %v989_v34 = vadd.f32 %v988_v43, %v960_v19 }
 0x716   :  { %v998_v3 = vmax.f32 %v989_v34, 0.0 }
 0x71b   :  { %v990_v11 = vpop.f32.mrf.mxu2 }
 0x71c   :  { %v991_v25 = vadd.f32 %v990_v11, %v960_v19 }
 0x71e   :  { %v999_v26 = vmax.f32 %v991_v25, 0.0 }
 0x720   :  { %v1002_v20 = vpack.c.bf16 %v999_v26, %v998_v3 }
 0x722   :  { %1274 = vmatmul.msk.bf16.vlgmr.msrb.gmra.mxu3 %vm1029_vm3, %v1002_v20 }
 0x738   :  { %v993_v27 = vpop.f32.mrf.mxu2 }
 0x739   :  { %v994_v1 = vadd.f32 %v993_v27, %v960_v19  ;;  %v1295_v27 = vld [vmem:[#allocation2 + $0x70] sm:$0xff] }
 0x73a   :  { %1198 = vmatpush.bf16.msra.mxu1 %v1295_v27 }
 0x73b   :  { %v1000_v23 = vmax.f32 %v994_v1, 0.0 }
 0x740   :  { %v995_v62 = vpop.f32.mrf.mxu2 }
 0x741   :  { %v996_v13 = vadd.f32 %v995_v62, %v960_v19 }
 0x743   :  { %v1001_v29 = vmax.f32 %v996_v13, 0.0  ;;  %v1294_v13 = vld [vmem:[#allocation2 + $0x68] sm:$0xff] }
 0x744   :  { %1199 = vmatpush.bf16.msra.mxu1 %v1294_v13 }
 0x745   :  { %v1003_v30 = vpack.c.bf16 %v1001_v29, %v1000_v23 }
 0x747   :  { %1275 = vmatmul.msk.bf16.gmra.mxu3 %vm1029_vm3, %v1003_v30 }
 0x7a5   :  { %v1045_v59 = vpop.f32.mrf.mxu3 }
 0x7a6   :  { %v1046_v4 = vadd.f32 %v1045_v59, %v1004_v31 }
 0x7a8   :  { %v1055_v10 = vadd.f32 %v1046_v4, %v1799_v44 }
 0x7aa   :  { %v1059_v33 = vsel %vm130_vm2, %v1055_v10, 0.0 }
 0x7ab   :  { %1060 = vadd.xlane.f32.xlu2 %v1059_v33 }
 0x7ad   :  { %v1047_v24 = vpop.f32.mrf.mxu3 }
 0x7ae   :  { %v1048_v17 = vadd.f32 %v1047_v24, %v1004_v31 }
 0x7b0   :  { %v1056_v49 = vadd.f32 %v1048_v17, %v1801_v47 }
 0x7b2   :  { %v1062_v44 = vsel %vm130_vm2, %v1056_v49, 0.0 }
 0x7ca   :  { %v1050_v32 = vpop.f32.mrf.mxu3 }
 0x7cb   :  { %v1051_v39 = vadd.f32 %v1050_v32, %v1004_v31 }
 0x7cd   :  { %v1057_v41 = vadd.f32 %v1051_v39, %v956_v60 }
 0x7cf   :  { %v1065_v58 = vsel %vm130_vm2, %v1057_v41, 0.0 }
 0x7d0   :  { %1066 = vadd.xlane.f32.xlu0 %v1065_v58 }
 0x7d2   :  { %v1052_v42 = vpop.f32.mrf.mxu3 }
 0x7d3   :  { %v1053_v14 = vadd.f32 %v1052_v42, %v1004_v31 }
 0x7d5   :  { %v1058_v50 = vadd.f32 %v1053_v14, %v957_v48 }
 0x7d7   :  { %v1068_v8 = vsel %vm130_vm2, %v1058_v50, 0.0 }
 0x7d8   :  { %1069 = vadd.xlane.f32.xlu1 %v1068_v8  ;;  %1063 = vadd.xlane.f32.xlu0 %v1062_v44  ;;  %v1147_v44 = vperm.slane %v1795_v37, 6 }
 0x81e   :  { %v1061_v15 = vpop.xlane.xlu2 %1060 }
 0x81f   :  { %v1071_v38 = vmul.f32 %v1061_v15, %v1775_v21 }
 0x821   :  { %v1820_v45 = vsub.f32 %v1055_v10, %v1071_v38 }
 0x823   :  { %v1079_v51 = vmul.f32 %v1820_v45, %v1820_v45 }
 0x825   :  { %v1083_v52 = vsel %vm130_vm2, %v1079_v51, 0.0 }
 0x826   :  { %1084 = vadd.xlane.f32.xlu0 %v1083_v52 }
 0x843   :  { %v1067_v54 = vpop.xlane.xlu0 %1066 }
 0x844   :  { %v1073_v47 = vmul.f32 %v1067_v54, %v1775_v21 }
 0x846   :  { %v1826_v55 = vsub.f32 %v1057_v41, %v1073_v47 }
 0x848   :  { %v1081_v16 = vmul.f32 %v1826_v55, %v1826_v55 }
 0x84a   :  { %v1089_v28 = vsel %vm130_vm2, %v1081_v16, 0.0 }
 0x84b   :  { %v1070_v36 = vpop.xlane.xlu1 %1069  ;;  %1090 = vadd.xlane.f32.xlu1 %v1089_v28  ;;  %v1064_v6 = vpop.xlane.xlu0 %1063 }
 0x84c   :  { %v1074_v56 = vmul.f32 %v1070_v36, %v1775_v21  ;;  %v1072_v35 = vmul.f32 %v1064_v6, %v1775_v21 }
 0x84e   :  { %v1833_v22 = vsub.f32 %v1058_v50, %v1074_v56  ;;  %v1835_v57 = vsub.f32 %v1056_v49, %v1072_v35 }
 0x850   :  { %v1080_v61 = vmul.f32 %v1835_v57, %v1835_v57  ;;  %v1082_v9 = vmul.f32 %v1833_v22, %v1833_v22 }
 0x852   :  { %v1086_v63 = vsel %vm130_vm2, %v1080_v61, 0.0  ;;  %v1092_v0 = vsel %vm130_vm2, %v1082_v9, 0.0 }
 0x853   :  { %1087 = vadd.xlane.f32.xlu1 %v1086_v63  ;;  %1093 = vadd.xlane.f32.xlu2 %v1092_v0  ;;  %v70_v0 = vld [vmem:[#allocation4 + $0x8] sm:$0xff] }
 0x899   :  { %v1085_v2 = vpop.xlane.xlu0 %1084 }
 0x89a   :  { %v1095_v5 = vmul.f32 %v1085_v2, %v1775_v21 }
 0x89c   :  { %v1099_v53 = vadd.f32 1e-05, %v1095_v5 }
 0x89e   :  { %1387 = vrsqrt.f32 %v1099_v53  ;;  %vm1109_vm9 = vweird.f32 %v1099_v53 }
 0x8a4   :  { %v1388_v46 = vpop.eup %1387 }
 0x8a5   :  { %v1104_v40 = vmul.f32 %v1388_v46, %v1099_v53  ;;  %vm1110_vm7 = vweird.f32 %v1388_v46 }
 0x8a6   :  { %vm1111_vm11 = vmor %vm1109_vm9, %vm1110_vm7 }
 0x8a7   :  { %v1105_v26 = vmul.f32 %v1388_v46, %v1104_v40 }
 0x8a9   :  { %v1106_v62 = vmul.f32 0.5, %v1105_v26 }
 0x8ab   :  { %v1107_v59 = vsub.f32 1.5, %v1106_v62 }
 0x8ad   :  { %v1108_v32 = vmul.f32 %v1388_v46, %v1107_v59 }
 0x8af   :  { %v1112_v49 = vsel %vm1111_vm11, %v1388_v46, %v1108_v32 }
 0x8b0   :  { %v1143_v51 = vmul.f32 %v1112_v49, %v1820_v45 }
 0x8b2   :  { %v1148_v6 = vmul.f32 %v1147_v44, %v1143_v51 }
 0x8be   :  { %v1091_v60 = vpop.xlane.xlu1 %1090 }
 0x8bf   :  { %v1097_v48 = vmul.f32 %v1091_v60, %v1775_v21 }
 0x8c1   :  { %v1101_v7 = vadd.f32 1e-05, %v1097_v48 }
 0x8c3   :  { %1389 = vrsqrt.f32 %v1101_v7  ;;  %vm1129_vm5 = vweird.f32 %v1101_v7 }
 0x8c6   :  { %v1088_v12 = vpop.xlane.xlu1 %1087  ;;  %v1094_v18 = vpop.xlane.xlu2 %1093 }
 0x8c7   :  { %v1096_v43 = vmul.f32 %v1088_v12, %v1775_v21  ;;  %v1098_v19 = vmul.f32 %v1094_v18, %v1775_v21 }
 0x8c9   :  { %v1390_v34 = vpop.eup %1389  ;;  %v1100_v11 = vadd.f32 1e-05, %v1096_v43  ;;  %v1102_v25 = vadd.f32 1e-05, %v1098_v19 }
 0x8ca   :  { %v1124_v3 = vmul.f32 %v1390_v34, %v1101_v7  ;;  %vm1130_vm4 = vweird.f32 %v1390_v34 }
 0x8cb   :  { %1391 = vrsqrt.f32 %v1100_v11  ;;  %vm1131_vm6 = vmor %vm1129_vm5, %vm1130_vm4  ;;  %vm1119_vm12 = vweird.f32 %v1100_v11  ;;  %vm1139_vm14 = vweird.f32 %v1102_v25 }
 0x8cc   :  { %v1125_v20 = vmul.f32 %v1390_v34, %v1124_v3  ;;  %1393 = vrsqrt.f32 %v1102_v25 }
 0x8ce   :  { %v1126_v1 = vmul.f32 0.5, %v1125_v20 }
 0x8d0   :  { %v1127_v23 = vsub.f32 1.5, %v1126_v1 }
 0x8d1   :  { %v1392_v29 = vpop.eup %1391 }
 0x8d2   :  { %v1394_v30 = vpop.eup %1393  ;;  %v1114_v31 = vmul.f32 %v1392_v29, %v1100_v11  ;;  %v1128_v4 = vmul.f32 %v1390_v34, %v1127_v23  ;;  %vm1120_vm8 = vweird.f32 %v1392_v29 }
 0x8d3   :  { %v1134_v21 = vmul.f32 %v1394_v30, %v1102_v25  ;;  %vm1140_vm10 = vweird.f32 %v1394_v30  ;;  %vm1121_vm13 = vmor %vm1119_vm12, %vm1120_vm8 }
 0x8d4   :  { %v1115_v10 = vmul.f32 %v1392_v29, %v1114_v31  ;;  %v1132_v39 = vsel %vm1131_vm6, %v1390_v34, %v1128_v4  ;;  %vm1141_vm15 = vmor %vm1139_vm14, %vm1140_vm10 }
 0x8d5   :  { %v1135_v33 = vmul.f32 %v1394_v30, %v1134_v21  ;;  %v1145_v42 = vmul.f32 %v1132_v39, %v1826_v55  ;;  %v1152_v55 = vperm.slane %v1795_v37, 7  ;;  %v1176_v37 = vperm.slane %v70_v0, 0 }
 0x8d6   :  { %v1116_v24 = vmul.f32 0.5, %v1115_v10 }
 0x8d7   :  { %v1136_v41 = vmul.f32 0.5, %v1135_v33  ;;  %v1150_v54 = vmul.f32 %v1147_v44, %v1145_v42  ;;  %v1153_v61 = vadd.f32 %v1152_v55, %v1148_v6 }
 0x8d8   :  { %v1117_v17 = vsub.f32 1.5, %v1116_v24 }
 0x8d9   :  { %v1137_v58 = vsub.f32 1.5, %v1136_v41  ;;  %v1155_v28 = vadd.f32 %v1152_v55, %v1150_v54 }
 0x8da   :  { %v1118_v14 = vmul.f32 %v1392_v29, %v1117_v17 }
 0x8db   :  { %v1138_v50 = vmul.f32 %v1394_v30, %v1137_v58 }
 0x8dc   :  { %v1122_v8 = vsel %vm1121_vm13, %v1392_v29, %v1118_v14 }
 0x8dd   :  { %v1144_v15 = vmul.f32 %v1122_v8, %v1835_v57  ;;  %v1142_v38 = vsel %vm1141_vm15, %v1394_v30, %v1138_v50  ;;  %v68_v57 = vld [vmem:[#allocation2 + $0x78] sm:$0xf] }
 0x8de   :  { %v1146_v52 = vmul.f32 %v1142_v38, %v1833_v22 }
 0x8df   :  { %v1149_v16 = vmul.f32 %v1147_v44, %v1144_v15 }
 0x8e0   :  { %v1151_v47 = vmul.f32 %v1147_v44, %v1146_v52 }
 0x8e1   :  { %v1154_v35 = vadd.f32 %v1152_v55, %v1149_v16 }
 0x8e2   :  { %v1156_v36 = vadd.f32 %v1152_v55, %v1151_v47 }
 0x8e3   :  { %v1157_v9 = vpack.c.bf16 %v1154_v35, %v1153_v61 }
 0x8e4   :  { %v1158_v56 = vpack.c.bf16 %v1156_v36, %v1155_v28 }
 0x8e6   :  { %1168 = vmatpush.bf16.msra.mxu0 %v1158_v56 }
 0x8ea   :  { %1169 = vmatpush.bf16.msra.mxu0 %v1157_v9 }
 0x8ed   :  { %1276 = vmatmul.msk.bf16.vlgmr.msra.gmra.mxu0 %vm130_vm2, %v68_v57 }
 0x96a   :  { %v1171_v45 = vpop.f32.mrf.mxu0 }
 0x96b   :  { %v1175_v63 = vpack.c.bf16 %v1171_v45, %v1171_v45 }
 0x96d   :  { %1285 = vmatmul.msk.bf16.vlgmr.msra.gmra.mxu1 %vm130_vm2, %v1175_v63 }
 0x972   :  { %v1173_v22 = vpop.f32.mrf.mxu0 }
 0x9ea   :  { %v1201_v2 = vpop.f32.mrf.mxu1 }
 0x9eb   :  { %v1202_v5 = vadd.f32 %v1201_v2, %v1176_v37 }
 0x9ed   :  { %1205 = vst [vmem:[%s1861_s3] sm:$0xff] %v1202_v5 }
 0x9f2   :  { %v1203_v53 = vpop.f32.mrf.mxu1 }
 0x9f3   :  { %1210 = vsyncpa [#allocation3], 1 }
 0x9f4   :  { %1211 = vsyncpa [#allocation5], 1 }

</bundles_post_ra>
